<compile_context>
chip_gen: v6e
topology: v6e:2x2x1
jax: 0.10.0
libtpu: 0.0.40
codegen_flags: <defaults>
</compile_context>

<pallas_src>
import functools

import numpy as np
import jax
import jax.numpy as jnp
from jax.experimental import pallas as pl
from jax.experimental.pallas import tpu as pltpu

EPS = 1e-5  # nn.BatchNorm2d default


# ---------------------------------------------------------------------------
# In-kernel helpers
# ---------------------------------------------------------------------------
def _fold_lanes(row, w, c):
    """(1, w*c) -> (1, c): sum the w channel-groups interleaved on the lane axis."""
    acc = row[:, 0:c]
    for i in range(1, w):
        acc = acc + row[:, i * c:(i + 1) * c]
    return acc


def _spread_lanes(vec, w):
    """(1, c) -> (1, w*c): tile a per-channel vector across the w lane groups."""
    return jnp.concatenate([vec] * w, axis=1)


def _bn_coeffs(sum_row, sumsq_row, gamma, beta, w, c, count):
    """Training-mode BatchNorm per-channel scale/shift, spread to (1, w*c).

    One-pass E[x^2] - mean^2 in f32: fine here (post-conv activations are near
    zero-mean); switch to a shifted two-pass / Welford accumulation if
    bit-closeness to PyTorch matters for large |mean|/std.
    """
    csum = _fold_lanes(sum_row, w, c)                       # (1, c)
    csq = _fold_lanes(sumsq_row, w, c)                      # (1, c)
    mean = csum / count
    var = jnp.maximum(csq / count - mean * mean, 0.0)       # biased variance
    scale = gamma * jax.lax.rsqrt(var + EPS)
    shift = beta - mean * scale
    return _spread_lanes(scale, w), _spread_lanes(shift, w)


def _conv_lhs(a, h):
    """Build the K = 3*W*C conv LHS for a stack of images in lane-dense rows.

    a: (R, W*C) bf16 with R = NB*h rows (NB images of height h stacked).
    Returns (R, 3*W*C) = [x(row-1) | x(row) | x(row+1)] with zero rows for the
    vertical 'same' padding, masking rows that would leak across images.
    """
    r, l = a.shape
    zrow = jnp.zeros((1, l), a.dtype)
    down = jnp.concatenate([zrow, a[:r - 1, :]], axis=0)    # x(row-1)  (dy = 0)
    up = jnp.concatenate([a[1:r, :], zrow], axis=0)         # x(row+1)  (dy = 2)
    rid = jax.lax.broadcasted_iota(jnp.int32, (r, 1), 0)
    down = jnp.where(rid % h != 0, down, jnp.zeros_like(down))
    up = jnp.where(rid % h != (h - 1), up, jnp.zeros_like(up))
    return jnp.concatenate([down, a, up], axis=1)


# ---------------------------------------------------------------------------
# Fused, phased DoubleConv kernel
# ---------------------------------------------------------------------------
def double_conv_kernel(x_ref, b1_ref, b2_ref, bnp_ref, o_ref,
                       z_scr, stats_scr, coef_scr, *, h, count):
    p = pl.program_id(0)          # phase: 0=conv1, 1=BN1+conv2, 2=BN2+store
    g = pl.program_id(1)          # batch-slab index
    R, L = o_ref.shape            # R = NB*h rows per slab, L = W*Cout
    Cout = bnp_ref.shape[1]
    W = L // Cout
    row0 = pl.multiple_of(g * R, R)

    # ---- phase 0: conv1 on slab g, accumulate BN1 stats incrementally -----
    @pl.when(p == 0)
    def _phase0():
        @pl.when(g == 0)
        def _():
            stats_scr[...] = jnp.zeros_like(stats_scr)
        lhs = _conv_lhs(x_ref[...], h)                              # (R, 3*W*Cin) bf16
        z1 = jnp.dot(lhs, b1_ref[...], preferred_element_type=jnp.float32)
        z_scr[pl.ds(row0, R), :] = z1.astype(z_scr.dtype)           # bf16 store
        stats_scr[0:1, :] += jnp.sum(z1, axis=0, keepdims=True)
        stats_scr[1:2, :] += jnp.sum(z1 * z1, axis=0, keepdims=True)

    # ---- phase 1: BN1+ReLU, conv2 on slab g, accumulate BN2 stats ---------
    @pl.when(p == 1)
    def _phase1():
        @pl.when(g == 0)
        def _():
            s, t = _bn_coeffs(stats_scr[0:1, :], stats_scr[1:2, :],
                              bnp_ref[0:1, :], bnp_ref[1:2, :], W, Cout, count)
            coef_scr[0:1, :] = s
            coef_scr[1:2, :] = t
        z1 = z_scr[pl.ds(row0, R), :].astype(jnp.float32)
        a1 = jnp.maximum(z1 * coef_scr[0:1, :] + coef_scr[1:2, :], 0.0)
        lhs = _conv_lhs(a1.astype(b2_ref.dtype), h)                 # single bf16 cast
        z2 = jnp.dot(lhs, b2_ref[...], preferred_element_type=jnp.float32)
        z_scr[pl.ds(row0, R), :] = z2.astype(z_scr.dtype)           # reuse z scratch
        stats_scr[2:3, :] += jnp.sum(z2, axis=0, keepdims=True)
        stats_scr[3:4, :] += jnp.sum(z2 * z2, axis=0, keepdims=True)

    # ---- phase 2: BN2+ReLU fused into the single streamed output store ----
    @pl.when(p == 2)
    def _phase2():
        @pl.when(g == 0)
        def _():
            s, t = _bn_coeffs(stats_scr[2:3, :], stats_scr[3:4, :],
                              bnp_ref[2:3, :], bnp_ref[3:4, :], W, Cout, count)
            coef_scr[2:3, :] = s
            coef_scr[3:4, :] = t
        z2 = z_scr[pl.ds(row0, R), :].astype(jnp.float32)
        o_ref[...] = jnp.maximum(z2 * coef_scr[2:3, :] + coef_scr[3:4, :], 0.0)


# ---------------------------------------------------------------------------
# Host-side weight preparation
# ---------------------------------------------------------------------------
def build_band_weights(w_oihw, W):
    """(Cout, Cin, 3, 3) conv weight -> (3*W*Cin, W*Cout) band matrix.

    B[dy*W*Cin + ws*Cin + ci, wd*Cout + co] = w[co, ci, dy, ws-wd+1], zero
    where the horizontal tap falls in the zero padding.  One matmul of the
    row-shifted LHS (R, 3*W*Cin) with B performs the whole 3x3 'same' conv in
    lane-dense layout.  NOTE: only 3/W of each K column is nonzero and the
    footprint grows as W^2*Cin*Cout - fine for small W / underfilled MXU; for
    large W tile the W axis or fall back to per-dx taps instead.
    """
    Cout, Cin, KH, KW = w_oihw.shape
    Wt = jnp.transpose(w_oihw, (2, 3, 1, 0))                 # (dy, dx, Cin, Cout)
    P = np.zeros((KW, W, W), np.float32)                     # P[dx, ws, wd]
    for dx in range(KW):
        for wd in range(W):
            ws = wd + dx - 1
            if 0 <= ws < W:
                P[dx, ws, wd] = 1.0
    B = jnp.einsum("xsw,yxio->ysiwo", jnp.asarray(P), Wt)    # (dy, ws, Cin, wd, Cout)
    return B.reshape(KH * W * Cin, W * Cout)


def init_double_conv_params(key, in_channels, out_channels):
    k1, k2, k3, k4 = jax.random.split(key, 4)
    w1 = 0.1 * jax.random.normal(k1, (out_channels, in_channels, 3, 3), jnp.float32)
    b1 = 0.1 * jax.random.normal(k2, (out_channels,), jnp.float32)
    w2 = 0.1 * jax.random.normal(k3, (out_channels, out_channels, 3, 3), jnp.float32)
    b2 = 0.1 * jax.random.normal(k4, (out_channels,), jnp.float32)
    # BatchNorm2d default affine init: gamma=1, beta=0.
    g1 = jnp.ones((out_channels,), jnp.float32)
    be1 = jnp.zeros((out_channels,), jnp.float32)
    g2 = jnp.ones((out_channels,), jnp.float32)
    be2 = jnp.zeros((out_channels,), jnp.float32)
    # b1/b2 kept for module fidelity but NOT consumed by the kernel (cancelled
    # exactly by the training-mode batch-mean subtraction).
    return dict(w1=w1, b1=b1, g1=g1, be1=be1, w2=w2, b2=b2, g2=g2, be2=be2)


@jax.jit
def double_conv(x_nchw, params):
    N, Cin, H, W = x_nchw.shape
    Cout = params["w1"].shape[0]

    # Batch elements per grid step: fill the MXU M dimension (<= 256 rows).
    nb = 1
    for d in range(1, N + 1):
        if N % d == 0 and d * H <= 256:
            nb = d
    R = nb * H               # rows per slab (matmul M)
    G = N // nb              # batch-slab grid extent

    # Single NCHW -> lane-dense (N*H, W*Cin) layout change at the module
    # boundary; matmul operands bf16, accumulation / BN math f32.
    x2d = jnp.transpose(x_nchw, (0, 2, 3, 1)).reshape(N * H, W * Cin)
    x2d = x2d.astype(jnp.bfloat16)

    b1 = build_band_weights(params["w1"], W).astype(jnp.bfloat16)   # (3*W*Cin,  W*Cout)
    b2 = build_band_weights(params["w2"], W).astype(jnp.bfloat16)   # (3*W*Cout, W*Cout)
    bnp = jnp.stack([params["g1"], params["be1"],
                     params["g2"], params["be2"]]).astype(jnp.float32)  # (4, Cout)

    kernel = functools.partial(double_conv_kernel, h=H, count=float(N * H * W))

    out2d = pl.pallas_call(
        kernel,
        out_shape=jax.ShapeDtypeStruct((N * H, W * Cout), jnp.float32),
        grid_spec=pltpu.PrefetchScalarGridSpec(
            num_scalar_prefetch=0,
            # Phase axis first (0=conv1, 1=BN1+conv2, 2=BN2+store); batch slabs
            # inner so each phase pipelines over the batch.
            grid=(3, G),
            in_specs=[
                # x is only consumed in phase 0; keep the index constant in the
                # later phases so it is not re-fetched.
                pl.BlockSpec((R, W * Cin),
                             lambda p, g: (jnp.where(p == 0, g, 0), 0)),
                pl.BlockSpec((3 * W * Cin, W * Cout), lambda p, g: (0, 0),
                             pipeline_mode=pl.Buffered(1)),
                pl.BlockSpec((3 * W * Cout, W * Cout), lambda p, g: (0, 0),
                             pipeline_mode=pl.Buffered(1)),
                pl.BlockSpec((4, Cout), lambda p, g: (0, 0),
                             pipeline_mode=pl.Buffered(1)),
            ],
            # Output streams one lane-dense slab per phase-2 step.
            out_specs=pl.BlockSpec((R, W * Cout), lambda p, g: (g, 0)),
            scratch_shapes=[
                # bf16 activation scratch, reused for conv1 then conv2 output.
                pltpu.VMEM((N * H, W * Cout), jnp.bfloat16),
                pltpu.VMEM((4, W * Cout), jnp.float32),   # BN sum / sumsq accumulators
                pltpu.VMEM((4, W * Cout), jnp.float32),   # BN scale / shift coefficients
            ],
        ),
        compiler_params=pltpu.CompilerParams(
            # Training-mode BN couples all batch elements and the phases are
            # ordered, so both axes are sequential ("arbitrary").
            # TODO(synk): on v7x (2 TCs) split the batch across cores via
            # core_map + a CMEM/VMEM_SHARED reduction of the (4, Cout) stats.
            dimension_semantics=("arbitrary", "arbitrary"),
            vmem_limit_bytes=32 * 1024 * 1024,
        ),
    )(x2d, b1, b2, bnp)

    # (N*H, W*Cout) lane-dense -> NCHW
    return jnp.transpose(out2d.reshape(N, H, W, Cout), (0, 3, 1, 2))


# ---------------------------------------------------------------------------
# Pure-JAX reference (f32) with the exact PyTorch training-mode semantics
# ---------------------------------------------------------------------------
def double_conv_reference(x, params):
    def block(x, w, b, gamma, beta):
        y = jax.lax.conv_general_dilated(
            x, w, window_strides=(1, 1), padding="SAME",
            dimension_numbers=("NCHW", "OIHW", "NCHW"))
        y = y + b[None, :, None, None]
        mean = jnp.mean(y, axis=(0, 2, 3), keepdims=True)
        var = jnp.var(y, axis=(0, 2, 3), keepdims=True)      # biased
        y = (y - mean) * jax.lax.rsqrt(var + EPS)
        y = y * gamma[None, :, None, None] + beta[None, :, None, None]
        return jnp.maximum(y, 0.0)

    y = block(x, params["w1"], params["b1"], params["g1"], params["be1"])
    return block(y, params["w2"], params["b2"], params["g2"], params["be2"])


if __name__ == "__main__":
    key = jax.random.PRNGKey(0)
    kx, kp = jax.random.split(key)

    in_channels, out_channels = 4, 8
    x = jax.random.normal(kx, (2, in_channels, 16, 16), jnp.float32)  # NCHW like PyTorch
    params = init_double_conv_params(kp, in_channels, out_channels)

    out = double_conv(x, params)
    jax.block_until_ready(out)

    assert out.shape == (2, out_channels, 16, 16), out.shape

    # Loose tolerance: kernel uses bf16 matmul operands / bf16 activation
    # scratch with f32 accumulation; any indexing/logic bug would be O(1) off.
    ref = double_conv_reference(x, params)
    err = float(jnp.max(jnp.abs(out - ref)))
    assert err < 0.1, f"max |err| vs reference = {err}"

    print("KERNEL_OK")
</pallas_src>

<mosaic_0001>
module attributes {stable_mosaic.version = 11 : i64} {
  func.func @double_conv_kernel(%arg0: i32, %arg1: i32, %arg2: memref<32x64xbf16, #tpu.memory_space<vmem>>, %arg3: memref<192x128xbf16, #tpu.memory_space<vmem>>, %arg4: memref<384x128xbf16, #tpu.memory_space<vmem>>, %arg5: memref<4x8xf32, #tpu.memory_space<vmem>>, %arg6: memref<32x128xf32, #tpu.memory_space<vmem>>, %arg7: memref<32x128xbf16, #tpu.memory_space<vmem>>, %arg8: memref<4x128xf32, #tpu.memory_space<vmem>>, %arg9: memref<4x128xf32, #tpu.memory_space<vmem>>) attributes {dimension_semantics = [#tpu.dimension_semantics<arbitrary>, #tpu.dimension_semantics<arbitrary>], iteration_bounds = array<i64: 3, 1>, scalar_prefetch = 0 : i64, scratch_operands = 3 : i64, tpu.core_type = #tpu.core_type<tc>, window_params = [{transform_indices = @transform_0, window_bounds = array<i64: 32, 64>}, {pipeline_mode = #tpu.pipeline_mode<synchronous>, transform_indices = @transform_1, window_bounds = array<i64: 192, 128>}, {pipeline_mode = #tpu.pipeline_mode<synchronous>, transform_indices = @transform_2, window_bounds = array<i64: 384, 128>}, {pipeline_mode = #tpu.pipeline_mode<synchronous>, transform_indices = @transform_3, window_bounds = array<i64: 4, 8>}, {transform_indices = @transform_4, window_bounds = array<i64: 32, 128>}]} {
    %c32_i32 = arith.constant 32 : i32
    %0 = arith.muli %arg1, %c32_i32 : i32
    %1 = tpu.assume_multiple %0, 32 : i32
    %c0_i32 = arith.constant 0 : i32
    %2 = arith.cmpi eq, %arg0, %c0_i32 : i32
    %3 = arith.extui %2 : i1 to i32
    %c0_i32_0 = arith.constant 0 : i32
    %4 = arith.cmpi ne, %3, %c0_i32_0 : i32
    scf.if %4 {
      %c0_i32_3 = arith.constant 0 : i32
      %11 = arith.cmpi eq, %arg1, %c0_i32_3 : i32
      %12 = arith.extui %11 : i1 to i32
      %c0_i32_4 = arith.constant 0 : i32
      %13 = arith.cmpi ne, %12, %c0_i32_4 : i32
      scf.if %13 {
        %cst_33 = arith.constant 0.000000e+00 : f32
        %82 = vector.broadcast %cst_33 : f32 to vector<4x128xf32>
        %c0_34 = arith.constant 0 : index
        %c0_35 = arith.constant 0 : index
        %83 = vector.load %arg8[%c0_34, %c0_35] : memref<4x128xf32, #tpu.memory_space<vmem>>, vector<4x128xf32>
        tpu.vector_store %arg8[%c0_34, %c0_35], %82 {strides = array<i32>} : memref<4x128xf32, #tpu.memory_space<vmem>>, vector<4x128xf32>,
      } else {
      }
      %c0 = arith.constant 0 : index
      %c0_5 = arith.constant 0 : index
      %14 = vector.load %arg2[%c0, %c0_5] : memref<32x64xbf16, #tpu.memory_space<vmem>>, vector<32x64xbf16>
      %cst = arith.constant 0.000000e+00 : bf16
      %15 = vector.broadcast %cst : bf16 to vector<1x64xbf16>
      %16 = vector.extract_strided_slice %14 {offsets = [0, 0], sizes = [31, 64], strides = [1, 1]} : vector<32x64xbf16> to vector<31x64xbf16>
      %17 = tpu.concatenate %15, %16 in 0 : vector<1x64xbf16>, vector<31x64xbf16> -> vector<32x64xbf16>
      %18 = vector.extract_strided_slice %14 {offsets = [1, 0], sizes = [31, 64], strides = [1, 1]} : vector<32x64xbf16> to vector<31x64xbf16>
      %19 = tpu.concatenate %18, %15 in 0 : vector<31x64xbf16>, vector<1x64xbf16> -> vector<32x64xbf16>
      %20 = tpu.iota {dimensions = array<i32: 0>} : vector<32x1xi32>
      %c16_i32 = arith.constant 16 : i32
      %c0_i32_6 = arith.constant 0 : i32
      %21 = arith.cmpi eq, %c16_i32, %c0_i32_6 : i32
      %c1_i32_7 = arith.constant 1 : i32
      %22 = arith.select %21, %c1_i32_7, %c16_i32 : i32
      %23 = vector.broadcast %22 : i32 to vector<32x1xi32>
      %24 = arith.remsi %20, %23 : vector<32x1xi32>
      %c0_i32_8 = arith.constant 0 : i32
      %25 = vector.broadcast %c0_i32_8 : i32 to vector<32x1xi32>
      %26 = arith.cmpi ne, %24, %25 : vector<32x1xi32>
      %c0_i32_9 = arith.constant 0 : i32
      %27 = vector.broadcast %c0_i32_9 : i32 to vector<32x1xi32>
      %28 = arith.cmpi slt, %24, %27 : vector<32x1xi32>
      %c0_i32_10 = arith.constant 0 : i32
      %29 = arith.cmpi slt, %22, %c0_i32_10 : i32
      %30 = vector.broadcast %29 : i1 to vector<32x1xi1>
      %31 = vector.broadcast %30 : vector<32x1xi1> to vector<32x1xi1>
      %32 = arith.xori %28, %31 : vector<32x1xi1>
      %33 = arith.andi %32, %26 : vector<32x1xi1>
      %34 = vector.broadcast %22 : i32 to vector<32x1xi32>
      %35 = arith.addi %24, %34 : vector<32x1xi32>
      %36 = arith.select %33, %35, %24 : vector<32x1xi1>, vector<32x1xi32>
      %c0_i32_11 = arith.constant 0 : i32
      %37 = vector.broadcast %c0_i32_11 : i32 to vector<32x1xi32>
      %38 = arith.cmpi ne, %36, %37 : vector<32x1xi32>
      %cst_12 = arith.constant 0.000000e+00 : bf16
      %39 = vector.broadcast %cst_12 : bf16 to vector<32x64xbf16>
      %40 = vector.shape_cast %38 : vector<32x1xi1> to vector<32x1xi1>
      %41 = vector.broadcast %40 : vector<32x1xi1> to vector<32x64xi1>
      %42 = arith.select %41, %17, %39 : vector<32x64xi1>, vector<32x64xbf16>
      %c16_i32_13 = arith.constant 16 : i32
      %c0_i32_14 = arith.constant 0 : i32
      %43 = arith.cmpi eq, %c16_i32_13, %c0_i32_14 : i32
      %c1_i32_15 = arith.constant 1 : i32
      %44 = arith.select %43, %c1_i32_15, %c16_i32_13 : i32
      %45 = vector.broadcast %44 : i32 to vector<32x1xi32>
      %46 = arith.remsi %20, %45 : vector<32x1xi32>
      %c0_i32_16 = arith.constant 0 : i32
      %47 = vector.broadcast %c0_i32_16 : i32 to vector<32x1xi32>
      %48 = arith.cmpi ne, %46, %47 : vector<32x1xi32>
      %c0_i32_17 = arith.constant 0 : i32
      %49 = vector.broadcast %c0_i32_17 : i32 to vector<32x1xi32>
      %50 = arith.cmpi slt, %46, %49 : vector<32x1xi32>
      %c0_i32_18 = arith.constant 0 : i32
      %51 = arith.cmpi slt, %44, %c0_i32_18 : i32
      %52 = vector.broadcast %51 : i1 to vector<32x1xi1>
      %53 = vector.broadcast %52 : vector<32x1xi1> to vector<32x1xi1>
      %54 = arith.xori %50, %53 : vector<32x1xi1>
      %55 = arith.andi %54, %48 : vector<32x1xi1>
      %56 = vector.broadcast %44 : i32 to vector<32x1xi32>
      %57 = arith.addi %46, %56 : vector<32x1xi32>
      %58 = arith.select %55, %57, %46 : vector<32x1xi1>, vector<32x1xi32>
      %c15_i32 = arith.constant 15 : i32
      %59 = vector.broadcast %c15_i32 : i32 to vector<32x1xi32>
      %60 = arith.cmpi ne, %58, %59 : vector<32x1xi32>
      %cst_19 = arith.constant 0.000000e+00 : bf16
      %61 = vector.broadcast %cst_19 : bf16 to vector<32x64xbf16>
      %62 = vector.shape_cast %60 : vector<32x1xi1> to vector<32x1xi1>
      %63 = vector.broadcast %62 : vector<32x1xi1> to vector<32x64xi1>
      %64 = arith.select %63, %19, %61 : vector<32x64xi1>, vector<32x64xbf16>
      %65 = tpu.concatenate %42, %14, %64 in 1 : vector<32x64xbf16>, vector<32x64xbf16>, vector<32x64xbf16> -> vector<32x192xbf16>
      %c0_20 = arith.constant 0 : index
      %c0_21 = arith.constant 0 : index
      %66 = vector.load %arg3[%c0_20, %c0_21] : memref<192x128xbf16, #tpu.memory_space<vmem>>, vector<192x128xbf16>
      %cst_22 = arith.constant dense<0.000000e+00> : vector<32x128xf32>
      %67 = tpu.matmul %65, %66, %cst_22 {dimension_numbers = #tpu.dot_dimension_numbers<[1], [0], [0], [1], [0, 0, 1, 1], [], []>} : vector<32x192xbf16>, vector<192x128xbf16>, vector<32x128xf32> -> vector<32x128xf32>
      %68 = arith.truncf %67 : vector<32x128xf32> to vector<32x128xbf16>
      %69 = arith.index_cast %1 : i32 to index
      %c0_23 = arith.constant 0 : index
      %70 = vector.load %arg7[%69, %c0_23] : memref<32x128xbf16, #tpu.memory_space<vmem>>, vector<32x128xbf16>
      tpu.vector_store %arg7[%69, %c0_23], %68 {strides = array<i32>} : memref<32x128xbf16, #tpu.memory_space<vmem>>, vector<32x128xbf16>,
      %c0_24 = arith.constant 0 : index
      %c0_25 = arith.constant 0 : index
      %71 = vector.load %arg8[%c0_24, %c0_25] : memref<4x128xf32, #tpu.memory_space<vmem>>, vector<1x128xf32>
      %cst_26 = arith.constant dense<0.000000e+00> : vector<128xf32>
      %72 = vector.multi_reduction <add>, %67, %cst_26 [0] : vector<32x128xf32> to vector<128xf32>
      %73 = vector.shape_cast %72 : vector<128xf32> to vector<1x128xf32>
      %74 = arith.addf %71, %73 : vector<1x128xf32>
      %c0_27 = arith.constant 0 : index
      %c0_28 = arith.constant 0 : index
      %75 = vector.load %arg8[%c0_27, %c0_28] : memref<4x128xf32, #tpu.memory_space<vmem>>, vector<1x128xf32>
      tpu.vector_store %arg8[%c0_27, %c0_28], %74 {strides = array<i32>} : memref<4x128xf32, #tpu.memory_space<vmem>>, vector<1x128xf32>,
      %c1 = arith.constant 1 : index
      %c0_29 = arith.constant 0 : index
      %76 = vector.load %arg8[%c1, %c0_29] : memref<4x128xf32, #tpu.memory_space<vmem>>, vector<1x128xf32>
      %77 = arith.mulf %67, %67 : vector<32x128xf32>
      %cst_30 = arith.constant dense<0.000000e+00> : vector<128xf32>
      %78 = vector.multi_reduction <add>, %77, %cst_30 [0] : vector<32x128xf32> to vector<128xf32>
      %79 = vector.shape_cast %78 : vector<128xf32> to vector<1x128xf32>
      %80 = arith.addf %76, %79 : vector<1x128xf32>
      %c1_31 = arith.constant 1 : index
      %c0_32 = arith.constant 0 : index
      %81 = vector.load %arg8[%c1_31, %c0_32] : memref<4x128xf32, #tpu.memory_space<vmem>>, vector<1x128xf32>
      tpu.vector_store %arg8[%c1_31, %c0_32], %80 {strides = array<i32>} : memref<4x128xf32, #tpu.memory_space<vmem>>, vector<1x128xf32>,
    } else {
    }
    %c1_i32 = arith.constant 1 : i32
    %5 = arith.cmpi eq, %arg0, %c1_i32 : i32
    %6 = arith.extui %5 : i1 to i32
    %c0_i32_1 = arith.constant 0 : i32
    %7 = arith.cmpi ne, %6, %c0_i32_1 : i32
    scf.if %7 {
      %c0_i32_3 = arith.constant 0 : i32
      %11 = arith.cmpi eq, %arg1, %c0_i32_3 : i32
      %12 = arith.extui %11 : i1 to i32
      %c0_i32_4 = arith.constant 0 : i32
      %13 = arith.cmpi ne, %12, %c0_i32_4 : i32
      scf.if %13 {
        %c0_35 = arith.constant 0 : index
        %c0_36 = arith.constant 0 : index
        %93 = vector.load %arg8[%c0_35, %c0_36] : memref<4x128xf32, #tpu.memory_space<vmem>>, vector<1x128xf32>
        %c1_37 = arith.constant 1 : index
        %c0_38 = arith.constant 0 : index
        %94 = vector.load %arg8[%c1_37, %c0_38] : memref<4x128xf32, #tpu.memory_space<vmem>>, vector<1x128xf32>
        %c0_39 = arith.constant 0 : index
        %c0_40 = arith.constant 0 : index
        %95 = vector.load %arg5[%c0_39, %c0_40] : memref<4x8xf32, #tpu.memory_space<vmem>>, vector<1x8xf32>
        %c1_41 = arith.constant 1 : index
        %c0_42 = arith.constant 0 : index
        %96 = vector.load %arg5[%c1_41, %c0_42] : memref<4x8xf32, #tpu.memory_space<vmem>>, vector<1x8xf32>
        %97 = vector.extract_strided_slice %93 {offsets = [0, 0], sizes = [1, 8], strides = [1, 1]} : vector<1x128xf32> to vector<1x8xf32>
        %98 = vector.extract_strided_slice %93 {offsets = [0, 8], sizes = [1, 8], strides = [1, 1]} : vector<1x128xf32> to vector<1x8xf32>
        %99 = arith.addf %97, %98 : vector<1x8xf32>
        %100 = vector.extract_strided_slice %93 {offsets = [0, 16], sizes = [1, 8], strides = [1, 1]} : vector<1x128xf32> to vector<1x8xf32>
        %101 = arith.addf %99, %100 : vector<1x8xf32>
        %102 = vector.extract_strided_slice %93 {offsets = [0, 24], sizes = [1, 8], strides = [1, 1]} : vector<1x128xf32> to vector<1x8xf32>
        %103 = arith.addf %101, %102 : vector<1x8xf32>
        %104 = vector.extract_strided_slice %93 {offsets = [0, 32], sizes = [1, 8], strides = [1, 1]} : vector<1x128xf32> to vector<1x8xf32>
        %105 = arith.addf %103, %104 : vector<1x8xf32>
        %106 = vector.extract_strided_slice %93 {offsets = [0, 40], sizes = [1, 8], strides = [1, 1]} : vector<1x128xf32> to vector<1x8xf32>
        %107 = arith.addf %105, %106 : vector<1x8xf32>
        %108 = vector.extract_strided_slice %93 {offsets = [0, 48], sizes = [1, 8], strides = [1, 1]} : vector<1x128xf32> to vector<1x8xf32>
        %109 = arith.addf %107, %108 : vector<1x8xf32>
        %110 = vector.extract_strided_slice %93 {offsets = [0, 56], sizes = [1, 8], strides = [1, 1]} : vector<1x128xf32> to vector<1x8xf32>
        %111 = arith.addf %109, %110 : vector<1x8xf32>
        %112 = vector.extract_strided_slice %93 {offsets = [0, 64], sizes = [1, 8], strides = [1, 1]} : vector<1x128xf32> to vector<1x8xf32>
        %113 = arith.addf %111, %112 : vector<1x8xf32>
        %114 = vector.extract_strided_slice %93 {offsets = [0, 72], sizes = [1, 8], strides = [1, 1]} : vector<1x128xf32> to vector<1x8xf32>
        %115 = arith.addf %113, %114 : vector<1x8xf32>
        %116 = vector.extract_strided_slice %93 {offsets = [0, 80], sizes = [1, 8], strides = [1, 1]} : vector<1x128xf32> to vector<1x8xf32>
        %117 = arith.addf %115, %116 : vector<1x8xf32>
        %118 = vector.extract_strided_slice %93 {offsets = [0, 88], sizes = [1, 8], strides = [1, 1]} : vector<1x128xf32> to vector<1x8xf32>
        %119 = arith.addf %117, %118 : vector<1x8xf32>
        %120 = vector.extract_strided_slice %93 {offsets = [0, 96], sizes = [1, 8], strides = [1, 1]} : vector<1x128xf32> to vector<1x8xf32>
        %121 = arith.addf %119, %120 : vector<1x8xf32>
        %122 = vector.extract_strided_slice %93 {offsets = [0, 104], sizes = [1, 8], strides = [1, 1]} : vector<1x128xf32> to vector<1x8xf32>
        %123 = arith.addf %121, %122 : vector<1x8xf32>
        %124 = vector.extract_strided_slice %93 {offsets = [0, 112], sizes = [1, 8], strides = [1, 1]} : vector<1x128xf32> to vector<1x8xf32>
        %125 = arith.addf %123, %124 : vector<1x8xf32>
        %126 = vector.extract_strided_slice %93 {offsets = [0, 120], sizes = [1, 8], strides = [1, 1]} : vector<1x128xf32> to vector<1x8xf32>
        %127 = arith.addf %125, %126 : vector<1x8xf32>
        %128 = vector.extract_strided_slice %94 {offsets = [0, 0], sizes = [1, 8], strides = [1, 1]} : vector<1x128xf32> to vector<1x8xf32>
        %129 = vector.extract_strided_slice %94 {offsets = [0, 8], sizes = [1, 8], strides = [1, 1]} : vector<1x128xf32> to vector<1x8xf32>
        %130 = arith.addf %128, %129 : vector<1x8xf32>
        %131 = vector.extract_strided_slice %94 {offsets = [0, 16], sizes = [1, 8], strides = [1, 1]} : vector<1x128xf32> to vector<1x8xf32>
        %132 = arith.addf %130, %131 : vector<1x8xf32>
        %133 = vector.extract_strided_slice %94 {offsets = [0, 24], sizes = [1, 8], strides = [1, 1]} : vector<1x128xf32> to vector<1x8xf32>
        %134 = arith.addf %132, %133 : vector<1x8xf32>
        %135 = vector.extract_strided_slice %94 {offsets = [0, 32], sizes = [1, 8], strides = [1, 1]} : vector<1x128xf32> to vector<1x8xf32>
        %136 = arith.addf %134, %135 : vector<1x8xf32>
        %137 = vector.extract_strided_slice %94 {offsets = [0, 40], sizes = [1, 8], strides = [1, 1]} : vector<1x128xf32> to vector<1x8xf32>
        %138 = arith.addf %136, %137 : vector<1x8xf32>
        %139 = vector.extract_strided_slice %94 {offsets = [0, 48], sizes = [1, 8], strides = [1, 1]} : vector<1x128xf32> to vector<1x8xf32>
        %140 = arith.addf %138, %139 : vector<1x8xf32>
        %141 = vector.extract_strided_slice %94 {offsets = [0, 56], sizes = [1, 8], strides = [1, 1]} : vector<1x128xf32> to vector<1x8xf32>
        %142 = arith.addf %140, %141 : vector<1x8xf32>
        %143 = vector.extract_strided_slice %94 {offsets = [0, 64], sizes = [1, 8], strides = [1, 1]} : vector<1x128xf32> to vector<1x8xf32>
        %144 = arith.addf %142, %143 : vector<1x8xf32>
        %145 = vector.extract_strided_slice %94 {offsets = [0, 72], sizes = [1, 8], strides = [1, 1]} : vector<1x128xf32> to vector<1x8xf32>
        %146 = arith.addf %144, %145 : vector<1x8xf32>
        %147 = vector.extract_strided_slice %94 {offsets = [0, 80], sizes = [1, 8], strides = [1, 1]} : vector<1x128xf32> to vector<1x8xf32>
        %148 = arith.addf %146, %147 : vector<1x8xf32>
        %149 = vector.extract_strided_slice %94 {offsets = [0, 88], sizes = [1, 8], strides = [1, 1]} : vector<1x128xf32> to vector<1x8xf32>
        %150 = arith.addf %148, %149 : vector<1x8xf32>
        %151 = vector.extract_strided_slice %94 {offsets = [0, 96], sizes = [1, 8], strides = [1, 1]} : vector<1x128xf32> to vector<1x8xf32>
        %152 = arith.addf %150, %151 : vector<1x8xf32>
        %153 = vector.extract_strided_slice %94 {offsets = [0, 104], sizes = [1, 8], strides = [1, 1]} : vector<1x128xf32> to vector<1x8xf32>
        %154 = arith.addf %152, %153 : vector<1x8xf32>
        %155 = vector.extract_strided_slice %94 {offsets = [0, 112], sizes = [1, 8], strides = [1, 1]} : vector<1x128xf32> to vector<1x8xf32>
        %156 = arith.addf %154, %155 : vector<1x8xf32>
        %157 = vector.extract_strided_slice %94 {offsets = [0, 120], sizes = [1, 8], strides = [1, 1]} : vector<1x128xf32> to vector<1x8xf32>
        %158 = arith.addf %156, %157 : vector<1x8xf32>
        %cst_43 = arith.constant 5.120000e+02 : f32
        %159 = vector.broadcast %cst_43 : f32 to vector<1x8xf32>
        %160 = arith.divf %127, %159 : vector<1x8xf32>
        %cst_44 = arith.constant 5.120000e+02 : f32
        %161 = vector.broadcast %cst_44 : f32 to vector<1x8xf32>
        %162 = arith.divf %158, %161 : vector<1x8xf32>
        %163 = arith.mulf %160, %160 : vector<1x8xf32>
        %164 = arith.subf %162, %163 : vector<1x8xf32>
        %cst_45 = arith.constant 0.000000e+00 : f32
        %165 = vector.broadcast %cst_45 : f32 to vector<1x8xf32>
        %166 = arith.maximumf %164, %165 : vector<1x8xf32>
        %cst_46 = arith.constant 9.99999974E-6 : f32
        %167 = vector.broadcast %cst_46 : f32 to vector<1x8xf32>
        %168 = arith.addf %166, %167 : vector<1x8xf32>
        %169 = math.rsqrt %168 : vector<1x8xf32>
        %170 = arith.mulf %95, %169 : vector<1x8xf32>
        %171 = arith.mulf %160, %170 : vector<1x8xf32>
        %172 = arith.subf %96, %171 : vector<1x8xf32>
        %173 = tpu.concatenate %170, %170, %170, %170, %170, %170, %170, %170, %170, %170, %170, %170, %170, %170, %170, %170 in 1 : vector<1x8xf32>, vector<1x8xf32>, vector<1x8xf32>, vector<1x8xf32>, vector<1x8xf32>, vector<1x8xf32>, vector<1x8xf32>, vector<1x8xf32>, vector<1x8xf32>, vector<1x8xf32>, vector<1x8xf32>, vector<1x8xf32>, vector<1x8xf32>, vector<1x8xf32>, vector<1x8xf32>, vector<1x8xf32> -> vector<1x128xf32>
        %174 = tpu.concatenate %172, %172, %172, %172, %172, %172, %172, %172, %172, %172, %172, %172, %172, %172, %172, %172 in 1 : vector<1x8xf32>, vector<1x8xf32>, vector<1x8xf32>, vector<1x8xf32>, vector<1x8xf32>, vector<1x8xf32>, vector<1x8xf32>, vector<1x8xf32>, vector<1x8xf32>, vector<1x8xf32>, vector<1x8xf32>, vector<1x8xf32>, vector<1x8xf32>, vector<1x8xf32>, vector<1x8xf32>, vector<1x8xf32> -> vector<1x128xf32>
        %c0_47 = arith.constant 0 : index
        %c0_48 = arith.constant 0 : index
        %175 = vector.load %arg9[%c0_47, %c0_48] : memref<4x128xf32, #tpu.memory_space<vmem>>, vector<1x128xf32>
        tpu.vector_store %arg9[%c0_47, %c0_48], %173 {strides = array<i32>} : memref<4x128xf32, #tpu.memory_space<vmem>>, vector<1x128xf32>,
        %c1_49 = arith.constant 1 : index
        %c0_50 = arith.constant 0 : index
        %176 = vector.load %arg9[%c1_49, %c0_50] : memref<4x128xf32, #tpu.memory_space<vmem>>, vector<1x128xf32>
        tpu.vector_store %arg9[%c1_49, %c0_50], %174 {strides = array<i32>} : memref<4x128xf32, #tpu.memory_space<vmem>>, vector<1x128xf32>,
      } else {
      }
      %14 = arith.index_cast %1 : i32 to index
      %c0 = arith.constant 0 : index
      %15 = vector.load %arg7[%14, %c0] : memref<32x128xbf16, #tpu.memory_space<vmem>>, vector<32x128xbf16>
      %16 = arith.extf %15 : vector<32x128xbf16> to vector<32x128xf32>
      %c0_5 = arith.constant 0 : index
      %c0_6 = arith.constant 0 : index
      %17 = vector.load %arg9[%c0_5, %c0_6] : memref<4x128xf32, #tpu.memory_space<vmem>>, vector<1x128xf32>
      %18 = vector.broadcast %17 : vector<1x128xf32> to vector<32x128xf32>
      %19 = arith.mulf %16, %18 : vector<32x128xf32>
      %c1 = arith.constant 1 : index
      %c0_7 = arith.constant 0 : index
      %20 = vector.load %arg9[%c1, %c0_7] : memref<4x128xf32, #tpu.memory_space<vmem>>, vector<1x128xf32>
      %21 = vector.broadcast %20 : vector<1x128xf32> to vector<32x128xf32>
      %22 = arith.addf %19, %21 : vector<32x128xf32>
      %cst = arith.constant 0.000000e+00 : f32
      %23 = vector.broadcast %cst : f32 to vector<32x128xf32>
      %24 = arith.maximumf %22, %23 : vector<32x128xf32>
      %25 = arith.truncf %24 : vector<32x128xf32> to vector<32x128xbf16>
      %cst_8 = arith.constant 0.000000e+00 : bf16
      %26 = vector.broadcast %cst_8 : bf16 to vector<1x128xbf16>
      %27 = vector.extract_strided_slice %25 {offsets = [0, 0], sizes = [31, 128], strides = [1, 1]} : vector<32x128xbf16> to vector<31x128xbf16>
      %28 = tpu.concatenate %26, %27 in 0 : vector<1x128xbf16>, vector<31x128xbf16> -> vector<32x128xbf16>
      %29 = vector.extract_strided_slice %25 {offsets = [1, 0], sizes = [31, 128], strides = [1, 1]} : vector<32x128xbf16> to vector<31x128xbf16>
      %30 = tpu.concatenate %29, %26 in 0 : vector<31x128xbf16>, vector<1x128xbf16> -> vector<32x128xbf16>
      %31 = tpu.iota {dimensions = array<i32: 0>} : vector<32x1xi32>
      %c16_i32 = arith.constant 16 : i32
      %c0_i32_9 = arith.constant 0 : i32
      %32 = arith.cmpi eq, %c16_i32, %c0_i32_9 : i32
      %c1_i32_10 = arith.constant 1 : i32
      %33 = arith.select %32, %c1_i32_10, %c16_i32 : i32
      %34 = vector.broadcast %33 : i32 to vector<32x1xi32>
      %35 = arith.remsi %31, %34 : vector<32x1xi32>
      %c0_i32_11 = arith.constant 0 : i32
      %36 = vector.broadcast %c0_i32_11 : i32 to vector<32x1xi32>
      %37 = arith.cmpi ne, %35, %36 : vector<32x1xi32>
      %c0_i32_12 = arith.constant 0 : i32
      %38 = vector.broadcast %c0_i32_12 : i32 to vector<32x1xi32>
      %39 = arith.cmpi slt, %35, %38 : vector<32x1xi32>
      %c0_i32_13 = arith.constant 0 : i32
      %40 = arith.cmpi slt, %33, %c0_i32_13 : i32
      %41 = vector.broadcast %40 : i1 to vector<32x1xi1>
      %42 = vector.broadcast %41 : vector<32x1xi1> to vector<32x1xi1>
      %43 = arith.xori %39, %42 : vector<32x1xi1>
      %44 = arith.andi %43, %37 : vector<32x1xi1>
      %45 = vector.broadcast %33 : i32 to vector<32x1xi32>
      %46 = arith.addi %35, %45 : vector<32x1xi32>
      %47 = arith.select %44, %46, %35 : vector<32x1xi1>, vector<32x1xi32>
      %c0_i32_14 = arith.constant 0 : i32
      %48 = vector.broadcast %c0_i32_14 : i32 to vector<32x1xi32>
      %49 = arith.cmpi ne, %47, %48 : vector<32x1xi32>
      %cst_15 = arith.constant 0.000000e+00 : bf16
      %50 = vector.broadcast %cst_15 : bf16 to vector<32x128xbf16>
      %51 = vector.shape_cast %49 : vector<32x1xi1> to vector<32x1xi1>
      %52 = vector.broadcast %51 : vector<32x1xi1> to vector<32x128xi1>
      %53 = arith.select %52, %28, %50 : vector<32x128xi1>, vector<32x128xbf16>
      %c16_i32_16 = arith.constant 16 : i32
      %c0_i32_17 = arith.constant 0 : i32
      %54 = arith.cmpi eq, %c16_i32_16, %c0_i32_17 : i32
      %c1_i32_18 = arith.constant 1 : i32
      %55 = arith.select %54, %c1_i32_18, %c16_i32_16 : i32
      %56 = vector.broadcast %55 : i32 to vector<32x1xi32>
      %57 = arith.remsi %31, %56 : vector<32x1xi32>
      %c0_i32_19 = arith.constant 0 : i32
      %58 = vector.broadcast %c0_i32_19 : i32 to vector<32x1xi32>
      %59 = arith.cmpi ne, %57, %58 : vector<32x1xi32>
      %c0_i32_20 = arith.constant 0 : i32
      %60 = vector.broadcast %c0_i32_20 : i32 to vector<32x1xi32>
      %61 = arith.cmpi slt, %57, %60 : vector<32x1xi32>
      %c0_i32_21 = arith.constant 0 : i32
      %62 = arith.cmpi slt, %55, %c0_i32_21 : i32
      %63 = vector.broadcast %62 : i1 to vector<32x1xi1>
      %64 = vector.broadcast %63 : vector<32x1xi1> to vector<32x1xi1>
      %65 = arith.xori %61, %64 : vector<32x1xi1>
      %66 = arith.andi %65, %59 : vector<32x1xi1>
      %67 = vector.broadcast %55 : i32 to vector<32x1xi32>
      %68 = arith.addi %57, %67 : vector<32x1xi32>
      %69 = arith.select %66, %68, %57 : vector<32x1xi1>, vector<32x1xi32>
      %c15_i32 = arith.constant 15 : i32
      %70 = vector.broadcast %c15_i32 : i32 to vector<32x1xi32>
      %71 = arith.cmpi ne, %69, %70 : vector<32x1xi32>
      %cst_22 = arith.constant 0.000000e+00 : bf16
      %72 = vector.broadcast %cst_22 : bf16 to vector<32x128xbf16>
      %73 = vector.shape_cast %71 : vector<32x1xi1> to vector<32x1xi1>
      %74 = vector.broadcast %73 : vector<32x1xi1> to vector<32x128xi1>
      %75 = arith.select %74, %30, %72 : vector<32x128xi1>, vector<32x128xbf16>
      %76 = tpu.concatenate %53, %25, %75 in 1 : vector<32x128xbf16>, vector<32x128xbf16>, vector<32x128xbf16> -> vector<32x384xbf16>
      %c0_23 = arith.constant 0 : index
      %c0_24 = arith.constant 0 : index
      %77 = vector.load %arg4[%c0_23, %c0_24] : memref<384x128xbf16, #tpu.memory_space<vmem>>, vector<384x128xbf16>
      %cst_25 = arith.constant dense<0.000000e+00> : vector<32x128xf32>
      %78 = tpu.matmul %76, %77, %cst_25 {dimension_numbers = #tpu.dot_dimension_numbers<[1], [0], [0], [1], [0, 0, 1, 1], [], []>} : vector<32x384xbf16>, vector<384x128xbf16>, vector<32x128xf32> -> vector<32x128xf32>
      %79 = arith.truncf %78 : vector<32x128xf32> to vector<32x128xbf16>
      %80 = arith.index_cast %1 : i32 to index
      %c0_26 = arith.constant 0 : index
      %81 = vector.load %arg7[%80, %c0_26] : memref<32x128xbf16, #tpu.memory_space<vmem>>, vector<32x128xbf16>
      tpu.vector_store %arg7[%80, %c0_26], %79 {strides = array<i32>} : memref<32x128xbf16, #tpu.memory_space<vmem>>, vector<32x128xbf16>,
      %c2 = arith.constant 2 : index
      %c0_27 = arith.constant 0 : index
      %82 = vector.load %arg8[%c2, %c0_27] : memref<4x128xf32, #tpu.memory_space<vmem>>, vector<1x128xf32>
      %cst_28 = arith.constant dense<0.000000e+00> : vector<128xf32>
      %83 = vector.multi_reduction <add>, %78, %cst_28 [0] : vector<32x128xf32> to vector<128xf32>
      %84 = vector.shape_cast %83 : vector<128xf32> to vector<1x128xf32>
      %85 = arith.addf %82, %84 : vector<1x128xf32>
      %c2_29 = arith.constant 2 : index
      %c0_30 = arith.constant 0 : index
      %86 = vector.load %arg8[%c2_29, %c0_30] : memref<4x128xf32, #tpu.memory_space<vmem>>, vector<1x128xf32>
      tpu.vector_store %arg8[%c2_29, %c0_30], %85 {strides = array<i32>} : memref<4x128xf32, #tpu.memory_space<vmem>>, vector<1x128xf32>,
      %c3 = arith.constant 3 : index
      %c0_31 = arith.constant 0 : index
      %87 = vector.load %arg8[%c3, %c0_31] : memref<4x128xf32, #tpu.memory_space<vmem>>, vector<1x128xf32>
      %88 = arith.mulf %78, %78 : vector<32x128xf32>
      %cst_32 = arith.constant dense<0.000000e+00> : vector<128xf32>
      %89 = vector.multi_reduction <add>, %88, %cst_32 [0] : vector<32x128xf32> to vector<128xf32>
      %90 = vector.shape_cast %89 : vector<128xf32> to vector<1x128xf32>
      %91 = arith.addf %87, %90 : vector<1x128xf32>
      %c3_33 = arith.constant 3 : index
      %c0_34 = arith.constant 0 : index
      %92 = vector.load %arg8[%c3_33, %c0_34] : memref<4x128xf32, #tpu.memory_space<vmem>>, vector<1x128xf32>
      tpu.vector_store %arg8[%c3_33, %c0_34], %91 {strides = array<i32>} : memref<4x128xf32, #tpu.memory_space<vmem>>, vector<1x128xf32>,
    } else {
    }
    %c2_i32 = arith.constant 2 : i32
    %8 = arith.cmpi eq, %arg0, %c2_i32 : i32
    %9 = arith.extui %8 : i1 to i32
    %c0_i32_2 = arith.constant 0 : i32
    %10 = arith.cmpi ne, %9, %c0_i32_2 : i32
    scf.if %10 {
      %c0_i32_3 = arith.constant 0 : i32
      %11 = arith.cmpi eq, %arg1, %c0_i32_3 : i32
      %12 = arith.extui %11 : i1 to i32
      %c0_i32_4 = arith.constant 0 : i32
      %13 = arith.cmpi ne, %12, %c0_i32_4 : i32
      scf.if %13 {
        %c2_9 = arith.constant 2 : index
        %c0_10 = arith.constant 0 : index
        %26 = vector.load %arg8[%c2_9, %c0_10] : memref<4x128xf32, #tpu.memory_space<vmem>>, vector<1x128xf32>
        %c3_11 = arith.constant 3 : index
        %c0_12 = arith.constant 0 : index
        %27 = vector.load %arg8[%c3_11, %c0_12] : memref<4x128xf32, #tpu.memory_space<vmem>>, vector<1x128xf32>
        %c2_13 = arith.constant 2 : index
        %c0_14 = arith.constant 0 : index
        %28 = vector.load %arg5[%c2_13, %c0_14] : memref<4x8xf32, #tpu.memory_space<vmem>>, vector<1x8xf32>
        %c3_15 = arith.constant 3 : index
        %c0_16 = arith.constant 0 : index
        %29 = vector.load %arg5[%c3_15, %c0_16] : memref<4x8xf32, #tpu.memory_space<vmem>>, vector<1x8xf32>
        %30 = vector.extract_strided_slice %26 {offsets = [0, 0], sizes = [1, 8], strides = [1, 1]} : vector<1x128xf32> to vector<1x8xf32>
        %31 = vector.extract_strided_slice %26 {offsets = [0, 8], sizes = [1, 8], strides = [1, 1]} : vector<1x128xf32> to vector<1x8xf32>
        %32 = arith.addf %30, %31 : vector<1x8xf32>
        %33 = vector.extract_strided_slice %26 {offsets = [0, 16], sizes = [1, 8], strides = [1, 1]} : vector<1x128xf32> to vector<1x8xf32>
        %34 = arith.addf %32, %33 : vector<1x8xf32>
        %35 = vector.extract_strided_slice %26 {offsets = [0, 24], sizes = [1, 8], strides = [1, 1]} : vector<1x128xf32> to vector<1x8xf32>
        %36 = arith.addf %34, %35 : vector<1x8xf32>
        %37 = vector.extract_strided_slice %26 {offsets = [0, 32], sizes = [1, 8], strides = [1, 1]} : vector<1x128xf32> to vector<1x8xf32>
        %38 = arith.addf %36, %37 : vector<1x8xf32>
        %39 = vector.extract_strided_slice %26 {offsets = [0, 40], sizes = [1, 8], strides = [1, 1]} : vector<1x128xf32> to vector<1x8xf32>
        %40 = arith.addf %38, %39 : vector<1x8xf32>
        %41 = vector.extract_strided_slice %26 {offsets = [0, 48], sizes = [1, 8], strides = [1, 1]} : vector<1x128xf32> to vector<1x8xf32>
        %42 = arith.addf %40, %41 : vector<1x8xf32>
        %43 = vector.extract_strided_slice %26 {offsets = [0, 56], sizes = [1, 8], strides = [1, 1]} : vector<1x128xf32> to vector<1x8xf32>
        %44 = arith.addf %42, %43 : vector<1x8xf32>
        %45 = vector.extract_strided_slice %26 {offsets = [0, 64], sizes = [1, 8], strides = [1, 1]} : vector<1x128xf32> to vector<1x8xf32>
        %46 = arith.addf %44, %45 : vector<1x8xf32>
        %47 = vector.extract_strided_slice %26 {offsets = [0, 72], sizes = [1, 8], strides = [1, 1]} : vector<1x128xf32> to vector<1x8xf32>
        %48 = arith.addf %46, %47 : vector<1x8xf32>
        %49 = vector.extract_strided_slice %26 {offsets = [0, 80], sizes = [1, 8], strides = [1, 1]} : vector<1x128xf32> to vector<1x8xf32>
        %50 = arith.addf %48, %49 : vector<1x8xf32>
        %51 = vector.extract_strided_slice %26 {offsets = [0, 88], sizes = [1, 8], strides = [1, 1]} : vector<1x128xf32> to vector<1x8xf32>
        %52 = arith.addf %50, %51 : vector<1x8xf32>
        %53 = vector.extract_strided_slice %26 {offsets = [0, 96], sizes = [1, 8], strides = [1, 1]} : vector<1x128xf32> to vector<1x8xf32>
        %54 = arith.addf %52, %53 : vector<1x8xf32>
        %55 = vector.extract_strided_slice %26 {offsets = [0, 104], sizes = [1, 8], strides = [1, 1]} : vector<1x128xf32> to vector<1x8xf32>
        %56 = arith.addf %54, %55 : vector<1x8xf32>
        %57 = vector.extract_strided_slice %26 {offsets = [0, 112], sizes = [1, 8], strides = [1, 1]} : vector<1x128xf32> to vector<1x8xf32>
        %58 = arith.addf %56, %57 : vector<1x8xf32>
        %59 = vector.extract_strided_slice %26 {offsets = [0, 120], sizes = [1, 8], strides = [1, 1]} : vector<1x128xf32> to vector<1x8xf32>
        %60 = arith.addf %58, %59 : vector<1x8xf32>
        %61 = vector.extract_strided_slice %27 {offsets = [0, 0], sizes = [1, 8], strides = [1, 1]} : vector<1x128xf32> to vector<1x8xf32>
        %62 = vector.extract_strided_slice %27 {offsets = [0, 8], sizes = [1, 8], strides = [1, 1]} : vector<1x128xf32> to vector<1x8xf32>
        %63 = arith.addf %61, %62 : vector<1x8xf32>
        %64 = vector.extract_strided_slice %27 {offsets = [0, 16], sizes = [1, 8], strides = [1, 1]} : vector<1x128xf32> to vector<1x8xf32>
        %65 = arith.addf %63, %64 : vector<1x8xf32>
        %66 = vector.extract_strided_slice %27 {offsets = [0, 24], sizes = [1, 8], strides = [1, 1]} : vector<1x128xf32> to vector<1x8xf32>
        %67 = arith.addf %65, %66 : vector<1x8xf32>
        %68 = vector.extract_strided_slice %27 {offsets = [0, 32], sizes = [1, 8], strides = [1, 1]} : vector<1x128xf32> to vector<1x8xf32>
        %69 = arith.addf %67, %68 : vector<1x8xf32>
        %70 = vector.extract_strided_slice %27 {offsets = [0, 40], sizes = [1, 8], strides = [1, 1]} : vector<1x128xf32> to vector<1x8xf32>
        %71 = arith.addf %69, %70 : vector<1x8xf32>
        %72 = vector.extract_strided_slice %27 {offsets = [0, 48], sizes = [1, 8], strides = [1, 1]} : vector<1x128xf32> to vector<1x8xf32>
        %73 = arith.addf %71, %72 : vector<1x8xf32>
        %74 = vector.extract_strided_slice %27 {offsets = [0, 56], sizes = [1, 8], strides = [1, 1]} : vector<1x128xf32> to vector<1x8xf32>
        %75 = arith.addf %73, %74 : vector<1x8xf32>
        %76 = vector.extract_strided_slice %27 {offsets = [0, 64], sizes = [1, 8], strides = [1, 1]} : vector<1x128xf32> to vector<1x8xf32>
        %77 = arith.addf %75, %76 : vector<1x8xf32>
        %78 = vector.extract_strided_slice %27 {offsets = [0, 72], sizes = [1, 8], strides = [1, 1]} : vector<1x128xf32> to vector<1x8xf32>
        %79 = arith.addf %77, %78 : vector<1x8xf32>
        %80 = vector.extract_strided_slice %27 {offsets = [0, 80], sizes = [1, 8], strides = [1, 1]} : vector<1x128xf32> to vector<1x8xf32>
        %81 = arith.addf %79, %80 : vector<1x8xf32>
        %82 = vector.extract_strided_slice %27 {offsets = [0, 88], sizes = [1, 8], strides = [1, 1]} : vector<1x128xf32> to vector<1x8xf32>
        %83 = arith.addf %81, %82 : vector<1x8xf32>
        %84 = vector.extract_strided_slice %27 {offsets = [0, 96], sizes = [1, 8], strides = [1, 1]} : vector<1x128xf32> to vector<1x8xf32>
        %85 = arith.addf %83, %84 : vector<1x8xf32>
        %86 = vector.extract_strided_slice %27 {offsets = [0, 104], sizes = [1, 8], strides = [1, 1]} : vector<1x128xf32> to vector<1x8xf32>
        %87 = arith.addf %85, %86 : vector<1x8xf32>
        %88 = vector.extract_strided_slice %27 {offsets = [0, 112], sizes = [1, 8], strides = [1, 1]} : vector<1x128xf32> to vector<1x8xf32>
        %89 = arith.addf %87, %88 : vector<1x8xf32>
        %90 = vector.extract_strided_slice %27 {offsets = [0, 120], sizes = [1, 8], strides = [1, 1]} : vector<1x128xf32> to vector<1x8xf32>
        %91 = arith.addf %89, %90 : vector<1x8xf32>
        %cst_17 = arith.constant 5.120000e+02 : f32
        %92 = vector.broadcast %cst_17 : f32 to vector<1x8xf32>
        %93 = arith.divf %60, %92 : vector<1x8xf32>
        %cst_18 = arith.constant 5.120000e+02 : f32
        %94 = vector.broadcast %cst_18 : f32 to vector<1x8xf32>
        %95 = arith.divf %91, %94 : vector<1x8xf32>
        %96 = arith.mulf %93, %93 : vector<1x8xf32>
        %97 = arith.subf %95, %96 : vector<1x8xf32>
        %cst_19 = arith.constant 0.000000e+00 : f32
        %98 = vector.broadcast %cst_19 : f32 to vector<1x8xf32>
        %99 = arith.maximumf %97, %98 : vector<1x8xf32>
        %cst_20 = arith.constant 9.99999974E-6 : f32
        %100 = vector.broadcast %cst_20 : f32 to vector<1x8xf32>
        %101 = arith.addf %99, %100 : vector<1x8xf32>
        %102 = math.rsqrt %101 : vector<1x8xf32>
        %103 = arith.mulf %28, %102 : vector<1x8xf32>
        %104 = arith.mulf %93, %103 : vector<1x8xf32>
        %105 = arith.subf %29, %104 : vector<1x8xf32>
        %106 = tpu.concatenate %103, %103, %103, %103, %103, %103, %103, %103, %103, %103, %103, %103, %103, %103, %103, %103 in 1 : vector<1x8xf32>, vector<1x8xf32>, vector<1x8xf32>, vector<1x8xf32>, vector<1x8xf32>, vector<1x8xf32>, vector<1x8xf32>, vector<1x8xf32>, vector<1x8xf32>, vector<1x8xf32>, vector<1x8xf32>, vector<1x8xf32>, vector<1x8xf32>, vector<1x8xf32>, vector<1x8xf32>, vector<1x8xf32> -> vector<1x128xf32>
        %107 = tpu.concatenate %105, %105, %105, %105, %105, %105, %105, %105, %105, %105, %105, %105, %105, %105, %105, %105 in 1 : vector<1x8xf32>, vector<1x8xf32>, vector<1x8xf32>, vector<1x8xf32>, vector<1x8xf32>, vector<1x8xf32>, vector<1x8xf32>, vector<1x8xf32>, vector<1x8xf32>, vector<1x8xf32>, vector<1x8xf32>, vector<1x8xf32>, vector<1x8xf32>, vector<1x8xf32>, vector<1x8xf32>, vector<1x8xf32> -> vector<1x128xf32>
        %c2_21 = arith.constant 2 : index
        %c0_22 = arith.constant 0 : index
        %108 = vector.load %arg9[%c2_21, %c0_22] : memref<4x128xf32, #tpu.memory_space<vmem>>, vector<1x128xf32>
        tpu.vector_store %arg9[%c2_21, %c0_22], %106 {strides = array<i32>} : memref<4x128xf32, #tpu.memory_space<vmem>>, vector<1x128xf32>,
        %c3_23 = arith.constant 3 : index
        %c0_24 = arith.constant 0 : index
        %109 = vector.load %arg9[%c3_23, %c0_24] : memref<4x128xf32, #tpu.memory_space<vmem>>, vector<1x128xf32>
        tpu.vector_store %arg9[%c3_23, %c0_24], %107 {strides = array<i32>} : memref<4x128xf32, #tpu.memory_space<vmem>>, vector<1x128xf32>,
      } else {
      }
      %14 = arith.index_cast %1 : i32 to index
      %c0 = arith.constant 0 : index
      %15 = vector.load %arg7[%14, %c0] : memref<32x128xbf16, #tpu.memory_space<vmem>>, vector<32x128xbf16>
      %16 = arith.extf %15 : vector<32x128xbf16> to vector<32x128xf32>
      %c2 = arith.constant 2 : index
      %c0_5 = arith.constant 0 : index
      %17 = vector.load %arg9[%c2, %c0_5] : memref<4x128xf32, #tpu.memory_space<vmem>>, vector<1x128xf32>
      %18 = vector.broadcast %17 : vector<1x128xf32> to vector<32x128xf32>
      %19 = arith.mulf %16, %18 : vector<32x128xf32>
      %c3 = arith.constant 3 : index
      %c0_6 = arith.constant 0 : index
      %20 = vector.load %arg9[%c3, %c0_6] : memref<4x128xf32, #tpu.memory_space<vmem>>, vector<1x128xf32>
      %21 = vector.broadcast %20 : vector<1x128xf32> to vector<32x128xf32>
      %22 = arith.addf %19, %21 : vector<32x128xf32>
      %cst = arith.constant 0.000000e+00 : f32
      %23 = vector.broadcast %cst : f32 to vector<32x128xf32>
      %24 = arith.maximumf %22, %23 : vector<32x128xf32>
      %c0_7 = arith.constant 0 : index
      %c0_8 = arith.constant 0 : index
      %25 = vector.load %arg6[%c0_7, %c0_8] : memref<32x128xf32, #tpu.memory_space<vmem>>, vector<32x128xf32>
      tpu.vector_store %arg6[%c0_7, %c0_8], %24 {strides = array<i32>} : memref<32x128xf32, #tpu.memory_space<vmem>>, vector<32x128xf32>,
    } else {
    }
    return
  }
  func.func @transform_0(%arg0: i32, %arg1: i32) -> (i32, i32) {
    %c0_i32 = arith.constant 0 : i32
    %0 = arith.cmpi eq, %arg0, %c0_i32 : i32
    %c0_i32_0 = arith.constant 0 : i32
    %1 = arith.select %0, %arg1, %c0_i32_0 : i32
    %c0_i32_1 = arith.constant 0 : i32
    %c0_i32_2 = arith.constant 0 : i32
    return %1, %c0_i32_1 : i32, i32
  }
  func.func @transform_1(%arg0: i32, %arg1: i32) -> (i32, i32) {
    %c0_i32 = arith.constant 0 : i32
    %c0_i32_0 = arith.constant 0 : i32
    %c0_i32_1 = arith.constant 0 : i32
    return %c0_i32, %c0_i32_0 : i32, i32
  }
  func.func @transform_2(%arg0: i32, %arg1: i32) -> (i32, i32) {
    %c0_i32 = arith.constant 0 : i32
    %c0_i32_0 = arith.constant 0 : i32
    %c0_i32_1 = arith.constant 0 : i32
    return %c0_i32, %c0_i32_0 : i32, i32
  }
  func.func @transform_3(%arg0: i32, %arg1: i32) -> (i32, i32) {
    %c0_i32 = arith.constant 0 : i32
    %c0_i32_0 = arith.constant 0 : i32
    %c0_i32_1 = arith.constant 0 : i32
    return %c0_i32, %c0_i32_0 : i32, i32
  }
  func.func @transform_4(%arg0: i32, %arg1: i32) -> (i32, i32) {
    %c0_i32 = arith.constant 0 : i32
    %c0_i32_0 = arith.constant 0 : i32
    return %arg1, %c0_i32 : i32, i32
  }
}

</mosaic_0001>

<bundles_post_ra>
// kernel: double_conv.1
= control target key start
LH: loop header
LB: loop body
LE: loop exit
PB: predicated region body
PF: predicated region fallthrough
CT: control target
= control target key end

     0   :  { %s2201_s15 = smov 0   ;;  %s2203_s16 = smov 0   ;;  %s2761_s0 = inlined_call_operand.vmem [shape: bf16[32,64], index: 0, kind: input, shape index: {}]   ;;  %s2762_s1 = inlined_call_operand.vmem [shape: bf16[192,128], index: 1, kind: input, shape index: {}]   ;;  %s2763_s2 = inlined_call_operand.vmem [shape: bf16[384,128], index: 2, kind: input, shape index: {}]   ;;  %s2764_s3 = inlined_call_operand.vmem [shape: f32[4,8], index: 3, kind: input, shape index: {}]   ;;  %s2765_s4 = inlined_call_operand.vmem [shape: f32[32,128], index: 4, kind: output, shape index: {}]  }
   0x1   :  { %s2205_s17 = smov 0  }
   0x2 LB: > { %s26_s18 = sadd.s32 1, %s2134_s16  ;;  %p1812_p0 = scmp.ge.s32.totalorder %s2138_s17, 1  ;;  %s2138_s17 = sphi %s2205_s17, %s14_s17   ;;  %s2134_s16 = sphi %s2203_s16, %s2787_s16   ;;  %s2130_s15 = sphi %s2201_s15, %s2786_s15  }
   0x3   : > { %p28_p1 = scmp.ge.s32.totalorder %s26_s18, 3  ;;  %p183_p2 = scmp.lt.s32.totalorder %s2138_s17, 4 }
   0x5   : > { %s2789_s18 = smov (%p28_p1, %s26_s18), 0  ;;  %p184_p3 = pnand %p1812_p0, %p183_p2 }
   0x6   : > { %p1813_p4 = scmp.ne.s32.totalorder (!%p184_p3), %s2130_s15, 0 }
   0x7   : > { %187 = sbr.rel (%p184_p3) target bundleno = 1379 (0x563), region = 36 }
   0xc   : > { %234 = sbr.rel (%p1813_p4) target bundleno = 354 (0x162), region = 40  ;;  %s2140_s23 = smov (!%p1813_p4), 64  }
  0x11   : > { %v2074_v0 = vld [vmem:[%s2761_s0] sm:$0xff]   ;;  %v2228_v1 = vld [vmem:[%s2761_s0 + $0x8] sm:$0xff]   ;;  %v2141_v2 = vmov 0   ;;  %v2076_v3 = vld [vmem:[%s2762_s1 + $0x38] sm:$0xff]   ;;  %v286_v4 = vlaneseq  ;;  %vm275_vm1 = vsmask.f32 7424 }
  0x12   : > { %399 = vrot.lane.b32.xlu0 %v2074_v0, %s2140_s23  ;;  %514 = vmatprep.subr.bf16.mxu0 %v2141_v2  ;;  %v259_v5 = vshll.u32 %v2074_v0, 16  ;;  %v2077_v6 = vld [vmem:[%s2762_s1 + $0x30] sm:$0xff]   ;;  %v256_v7 = vshrl.u32 %v2074_v0, 16  ;;  %v2078_v8 = vld [vmem:[%s2762_s1 + $0x28] sm:$0xff]   ;;  %v266_v10 = vshll.u32 %v2228_v1, 16  ;;  %v2079_v13 = vld [vmem:[%s2762_s1 + $0x20] sm:$0xff]  }
  0x13   : > { %1990 = vmatprep.subr.bf16.mxu1 %v2141_v2  ;;  %515 = vmatpush1.bf16.msra.mxu0 %v2076_v3  ;;  %v287_v9 = vshrl.u32 %v286_v4, 7  ;;  %vm2142_vm2 = vmmov 1   ;;  %vm254_vm4 = vsmask.f32 256  ;;  %vm272_vm5 = vcmask 1040384   ;;  %v2080_v23 = vld [vmem:[%s2762_s1 + $0x18] sm:$0xff]  }
  0x14   : > { %2002 = vmatpush1.bf16.msra.mxu1 %v2076_v3  ;;  %516 = vmatprep.subr.bf16.mxu0 %v2141_v2  ;;  %v276_v11 = vrot.slane %v259_v5, 1  ;;  %v278_v16 = vrot.slane %v266_v10, 1  ;;  %v258_v17 = vrot.slane %v256_v7, 7  ;;  %vm352_vm3 = vmpackc.low %vm2142_vm2, %vm2142_vm2  ;;  %v263_v22 = vshrl.u32 %v2228_v1, 16  ;;  %v2081_v37 = vld [vmem:[%s2762_s1 + $0x10] sm:$0xff]   ;;  %v2082_v48 = vld [vmem:[%s2762_s1 + $0x8] sm:$0xff]  }
  0x15   : > { %1991 = vmatprep.subr.bf16.mxu1 %v2141_v2  ;;  %v288_v12 = vadd.s32 8, %v287_v9  ;;  %v356_v20 = vsel %vm352_vm3, 65537, %v2141_v2  ;;  %v295_v21 = vand.u32 15, %v287_v9  ;;  %v290_v26 = vadd.s32 24, %v287_v9  ;;  %vm2270_vm7 = vmand %vm272_vm5, %vm254_vm4  ;;  %v2083_v53 = vld [vmem:[%s2762_s1] sm:$0xff]   ;;  %v2084_v54 = vld [vmem:[%s2762_s1 + $0x58] sm:$0xff]  }
  0x16   : > { %401 = vrot.lane.b32.xlu0 %v2228_v1, %s2140_s23  ;;  %v277_v15 = vor.u32 %v276_v11, %v256_v7  ;;  %v261_v19 = vor.u32 %v259_v5, %v258_v17  ;;  %v289_v27 = vadd.s32 16, %v287_v9  ;;  %v265_v30 = vrot.slane %v263_v22, 7  ;;  %v2085_v55 = vld [vmem:[%s2762_s1 + $0x50] sm:$0xff]   ;;  %v2086_v56 = vld [vmem:[%s2762_s1 + $0x48] sm:$0xff]   ;;  %v2087_v57 = vld [vmem:[%s2762_s1 + $0x40] sm:$0xff]  }
  0x17   : > { %517 = vmatpush1.bf16.msra.mxu0 %v2077_v6  ;;  %v302_v14 = vand.u32 15, %v288_v12  ;;  %vm339_vm8 = vcmp.ne.s32.totalorder %v295_v21, 0  ;;  %vm283_vm9 = vcmask 1047552   ;;  %vm403_vm10 = vcmask 523264  }
  0x18   : > { %2003 = vmatpush1.bf16.msra.mxu1 %v2077_v6  ;;  %518 = vmatprep.subr.bf16.mxu0 %v2141_v2  ;;  %v279_v24 = vsel %vm275_vm1, %v277_v15, %v278_v16  ;;  %vm351_vm11 = vmpackc.low %vm339_vm8, %vm339_vm8  ;;  %v316_v31 = vand.u32 15, %v290_v26  ;;  %v309_v32 = vand.u32 15, %v289_v27  ;;  %v280_v35 = vor.u32 %v278_v16, %v263_v22 }
  0x19   : > { %1992 = vmatprep.subr.bf16.mxu1 %v2141_v2  ;;  %vm2252_vm0 = vcmp.ne.s32.totalorder %v302_v14, 15  ;;  %v355_v34 = vsel %vm351_vm11, 65537, %v2141_v2  ;;  %v268_v36 = vor.u32 %v266_v10, %v265_v30  ;;  %v274_v39 = vsel %vm2270_vm7, 0, %v261_v19  ;;  %vm2288_vm13 = vmand %vm283_vm9, %vm275_vm1 }
  0x1a   : > { %vm382_vm6 = vmpackc.low %vm2252_vm0, %vm2252_vm0  ;;  %v1816_v40 = vcombine.low %v355_v34, %v356_v20  ;;  %vm372_vm14 = vcmp.ne.s32.totalorder %v316_v31, 15  ;;  %vm341_vm0 = vcmp.ne.s32.totalorder %v309_v32, 0  ;;  %v285_v45 = vsel %vm2288_vm13, %v280_v35, 0 }
  0x1b   : > { %519 = vmatpush1.bf16.msra.mxu0 %v2078_v8  ;;  %v386_v25 = vsel %vm382_vm6, 65537, %v2141_v2  ;;  %vm384_vm15 = vmpackc.low %vm372_vm14, %vm372_vm14  ;;  %v269_v42 = vsel %vm254_vm4, %v258_v17, %v268_v36  ;;  %v2143_v62 = vmov 0.0  }
  0x1c   : > { %2004 = vmatpush1.bf16.msra.mxu1 %v2078_v8  ;;  %520 = vmatprep.subr.bf16.mxu0 %v2141_v2  ;;  %v1818_v28 = vcombine.low %v356_v20, %v386_v25  ;;  %vm365_vm2 = vcmp.ne.s16.totalorder %v1816_v40, 0  ;;  %v388_v43 = vsel %vm384_vm15, 65537, %v2141_v2  ;;  %vm353_vm3 = vmpackc.low %vm341_vm0, %vm341_vm0  ;;  %239 = vst [vmem:[#allocation3] sm:$0xf] %v2143_v62 }
  0x1d   : > { %1993 = vmatprep.subr.bf16.mxu1 %v2141_v2  ;;  %v367_v44 = vsel %vm365_vm2, %v274_v39, 0  ;;  %v1819_v46 = vcombine.low %v356_v20, %v388_v43  ;;  %v357_v47 = vsel %vm353_vm3, 65537, %v2141_v2 }
  0x1e   : > { %vm2274_vm12 = vcmp.ne.s16.totalorder %v1818_v28, 0  ;;  %v1817_v49 = vcombine.low %v357_v47, %v356_v20 }
  0x1f   : > { %521 = vmatpush1.bf16.msra.mxu0 %v2079_v13  ;;  %v397_v38 = vsel %vm2274_vm12, %v279_v24, 0  ;;  %vm396_vm1 = vcmp.ne.s16.totalorder %v1819_v46, 0 }
  0x20   : > { %2005 = vmatpush1.bf16.msra.mxu1 %v2079_v13  ;;  %522 = vmatprep.subr.bf16.mxu0 %v2141_v2  ;;  %v398_v50 = vsel %vm396_vm1, %v285_v45, 0  ;;  %vm2305_vm4 = vcmp.ne.s16.totalorder %v1817_v49, 0 }
  0x21   : > { %1994 = vmatprep.subr.bf16.mxu1 %v2141_v2  ;;  %1832 = vmatprep.mubr.msk.bf16.mxu0 %vm403_vm10, %v397_v38  ;;  %v368_v52 = vsel %vm2305_vm4, %v269_v42, 0 }
  0x22   : > { %1833 = vmatprep.mubr.msk.bf16.mxu1 %vm403_vm10, %v398_v50 }
  0x23   : > { %523 = vmatpush1.bf16.msra.mxu0 %v2080_v23  ;;  %v587_v28 = vld [vmem:[#allocation3] sm:$0x1]  ;;  %v599_v31 = vld [vmem:[#allocation3 + $0x1] sm:$0x1] }
  0x24   : > { %2006 = vmatpush1.bf16.msra.mxu1 %v2080_v23  ;;  %524 = vmatprep.subr.bf16.mxu0 %v2141_v2 }
  0x25   : > { %1995 = vmatprep.subr.bf16.mxu1 %v2141_v2 }
  0x27   : > { %525 = vmatpush1.bf16.msra.mxu0 %v2081_v37 }
  0x28   : > { %2007 = vmatpush1.bf16.msra.mxu1 %v2081_v37  ;;  %526 = vmatprep.subr.bf16.mxu0 %v2141_v2 }
  0x29   : > { %1996 = vmatprep.subr.bf16.mxu1 %v2141_v2 }
  0x2b   : > { %527 = vmatpush1.bf16.msra.mxu0 %v2082_v48 }
  0x2c   : > { %2008 = vmatpush1.bf16.msra.mxu1 %v2082_v48  ;;  %528 = vmatprep.subr.bf16.mxu0 %v2141_v2 }
  0x2d   : > { %1997 = vmatprep.subr.bf16.mxu1 %v2141_v2 }
  0x2f   : > { %529 = vmatpush1.bf16.msra.mxu0 %v2083_v53 }
  0x30   : > { %2009 = vmatpush1.bf16.msra.mxu1 %v2083_v53  ;;  %538 = vmatprep.subr.bf16.mxu0 %v2141_v2 }
  0x31   : > { %1998 = vmatprep.subr.bf16.mxu1 %v2141_v2 }
  0x33   : > { %539 = vmatpush2.bf16.msra.mxu0 %v2084_v54 }
  0x34   : > { %2010 = vmatpush2.bf16.msra.mxu1 %v2084_v54  ;;  %540 = vmatprep.subr.bf16.mxu0 %v2141_v2 }
  0x35   : > { %1999 = vmatprep.subr.bf16.mxu1 %v2141_v2 }
  0x37   : > { %541 = vmatpush2.bf16.msra.mxu0 %v2085_v55 }
  0x38   : > { %2011 = vmatpush2.bf16.msra.mxu1 %v2085_v55  ;;  %542 = vmatprep.subr.bf16.mxu0 %v2141_v2 }
  0x39   : > { %2000 = vmatprep.subr.bf16.mxu1 %v2141_v2 }
  0x3b   : > { %543 = vmatpush2.bf16.msra.mxu0 %v2086_v56 }
  0x3c   : > { %2012 = vmatpush2.bf16.msra.mxu1 %v2086_v56  ;;  %544 = vmatprep.subr.bf16.mxu0 %v2141_v2 }
  0x3d   : > { %2001 = vmatprep.subr.bf16.mxu1 %v2141_v2 }
  0x3f   : > { %545 = vmatpush2.bf16.msra.mxu0 %v2087_v57 }
  0x40   : > { %2013 = vmatpush2.bf16.msra.mxu1 %v2087_v57 }
  0x84   : > { %v400_v58 = vpop.permute.xlu0 %399 }
  0x85   : > { %v406_v59 = vsel %vm403_vm10, %v367_v44, %v400_v58 }
  0x86   : > { %547 = vmatmul.mubr.bf16.vlgmr.msra.gmra.mxu0 %v406_v59 }
  0x88   : > { %v402_v60 = vpop.permute.xlu0 %401 }
  0x89   : > { %v410_v61 = vsel %vm403_vm10, %v368_v52, %v402_v60 }
  0x8a   : > { %555 = vmatmul.mubr.bf16.vlgmr.msra.gmra.mxu1 %v410_v61 }
 0x146   : > { %v548_v63 = vpop.f32.mrf.mxu0 }
 0x147   : > { %v600_v4 = vmul.f32 %v548_v63, %v548_v63 }
 0x148   : > { %v550_v0 = vpop.f32.mrf.mxu0 }
 0x14a   : > { %v551_v1 = vpop.f32.mrf.mxu0  ;;  %v556_v3 = vpop.f32.mrf.mxu1 }
 0x14b   : > { %v1895_v5 = vpack.c.bf16 %v551_v1, %v548_v63  ;;  %v588_v6 = vadd.f32 %v551_v1, %v548_v63  ;;  %v601_v2 = vmul.f32 %v551_v1, %v551_v1  ;;  %v602_v11 = vmul.f32 %v556_v3, %v556_v3 }
 0x14c   : > { %v553_v7 = vpop.f32.mrf.mxu0  ;;  %v558_v8 = vpop.f32.mrf.mxu1 }
 0x14d   : > { %1896 = vst [vmem:[#allocation2] sm:$0xff] %v1895_v5   ;;  %v604_v9 = vadd.f32 %v601_v2, %v600_v4  ;;  %v589_v10 = vadd.f32 %v588_v6, %v556_v3 }
 0x14e   : > { %v559_v12 = vpop.f32.mrf.mxu1 }
 0x14f   : > { %v605_v13 = vadd.f32 %v604_v9, %v602_v11  ;;  %v1900_v14 = vpack.c.bf16 %v559_v12, %v556_v3  ;;  %v590_v15 = vadd.f32 %v589_v10, %v559_v12  ;;  %v603_v16 = vmul.f32 %v559_v12, %v559_v12 }
 0x150   : > { %v561_v17 = vpop.f32.mrf.mxu1 }
 0x151   : > { %1928 = vst [vmem:[#allocation2 + $0x8] sm:$0xff] %v1900_v14   ;;  %v591_v18 = vrot.slane %v590_v15, 4  ;;  %v606_v19 = vadd.f32 %v605_v13, %v603_v16 }
 0x153   : > { %v592_v20 = vadd.f32 %v591_v18, %v590_v15  ;;  %v607_v21 = vrot.slane %v606_v19, 4 }
 0x155   : > { %v593_v22 = vrot.slane %v592_v20, 2  ;;  %v608_v23 = vadd.f32 %v607_v21, %v606_v19 }
 0x157   : > { %v594_v24 = vadd.f32 %v593_v22, %v592_v20  ;;  %v609_v25 = vrot.slane %v608_v23, 2 }
 0x159   : > { %v595_v26 = vrot.slane %v594_v24, 1  ;;  %v610_v27 = vadd.f32 %v609_v25, %v608_v23 }
 0x15b   : > { %v596_v29 = vadd.f32 %v595_v26, %v594_v24  ;;  %v611_v30 = vrot.slane %v610_v27, 1 }
 0x15d   : > { %v597_v32 = vadd.f32 %v596_v29, %v587_v28  ;;  %v612_v33 = vadd.f32 %v611_v30, %v610_v27 }
 0x15f   : > { %598 = vst [vmem:[#allocation3] sm:$0x1] %v597_v32  ;;  %v613_v34 = vadd.f32 %v612_v33, %v599_v31 }
 0x161   : > { %614 = vst [vmem:[#allocation3 + $0x1] sm:$0x1] %v613_v34 }
 0x162 PF: > { %p1838_p5 = scmp.ne.s32.totalorder %s2130_s15, 1 }
 0x163   : > { %s2144_s26 = smov (!%p1838_p5), 120   ;;  %s2145_s27 = smov (!%p1838_p5), 104  }
 0x164   : > { %618 = sbr.rel (%p1838_p5) target bundleno = 985 (0x3d9), region = 48  ;;  %s2146_s28 = smov (!%p1838_p5), 112  }
 0x165   : > { %s2147_s29 = smov (!%p1838_p5), 96   ;;  %s2148_s30 = smov (!%p1838_p5), 88  }
 0x166   : > { %s2149_s5 = smov (!%p1838_p5), 80   ;;  %s2150_s6 = smov (!%p1838_p5), 72  }
 0x167   : > { %s2151_s7 = smov (!%p1838_p5), 64   ;;  %s2152_s8 = smov (!%p1838_p5), 56  }
 0x168   : > { %s2153_s9 = smov (!%p1838_p5), 48   ;;  %s2154_s10 = smov (!%p1838_p5), 40  }
 0x169   : > { %v2340_v35 = vld [vmem:[#allocation3 + $0x1] sm:$0x1]  ;;  %v623_v36 = vld [vmem:[#allocation3] sm:$0x1]  ;;  %s2155_s11 = smov 32   ;;  %s2156_s12 = smov 24  }
 0x16a   : > { %689 = vrot.lane.b32.xlu1 %v2340_v35, %s2144_s26  ;;  %628 = vrot.lane.b32.xlu0 %v623_v36, %s2144_s26  ;;  %s2157_s13 = smov 16   ;;  %s2158_s14 = smov 8   ;;  %vm806_vm5 = vcmask 64512   ;;  %vm808_vm6 = vcmask 130048   ;;  %vm810_vm7 = vcmask 195584   ;;  %vm812_vm8 = vcmask 261120  }
 0x16b   : > { %vm814_vm9 = vcmask 326656   ;;  %vm816_vm10 = vcmask 392192   ;;  %vm818_vm11 = vcmask 457728   ;;  %vm820_vm12 = vcmask 523264  }
 0x16c   : > { %vm822_vm13 = vcmask 588800   ;;  %vm824_vm14 = vcmask 654336   ;;  %vm826_vm15 = vcmask 719872   ;;  %vm828_vm0 = vcmask 785408  }
 0x16d   : > { %vm830_vm2 = vcmask 850944   ;;  %vm832_vm3 = vcmask 916480   ;;  %vm834_vm1 = vcmask 982016  }
 0x16e   : > { %636 = vrot.lane.b32.xlu1 %v623_v36, %s2145_s27  ;;  %632 = vrot.lane.b32.xlu0 %v623_v36, %s2146_s28 }
 0x172   : > { %640 = vrot.lane.b32.xlu1 %v623_v36, %s2147_s29  ;;  %693 = vrot.lane.b32.xlu0 %v2340_v35, %s2146_s28 }
 0x176   : > { %644 = vrot.lane.b32.xlu1 %v623_v36, %s2148_s30  ;;  %697 = vrot.lane.b32.xlu0 %v2340_v35, %s2145_s27 }
 0x17a   : > { %648 = vrot.lane.b32.xlu1 %v623_v36, %s2149_s5  ;;  %701 = vrot.lane.b32.xlu0 %v2340_v35, %s2147_s29 }
 0x17e   : > { %652 = vrot.lane.b32.xlu1 %v623_v36, %s2150_s6  ;;  %705 = vrot.lane.b32.xlu0 %v2340_v35, %s2148_s30 }
 0x182   : > { %656 = vrot.lane.b32.xlu1 %v623_v36, %s2151_s7  ;;  %709 = vrot.lane.b32.xlu0 %v2340_v35, %s2149_s5 }
 0x186   : > { %660 = vrot.lane.b32.xlu1 %v623_v36, %s2152_s8  ;;  %713 = vrot.lane.b32.xlu0 %v2340_v35, %s2150_s6 }
 0x18a   : > { %664 = vrot.lane.b32.xlu1 %v623_v36, %s2153_s9  ;;  %717 = vrot.lane.b32.xlu0 %v2340_v35, %s2151_s7 }
 0x18e   : > { %668 = vrot.lane.b32.xlu1 %v623_v36, %s2154_s10  ;;  %721 = vrot.lane.b32.xlu0 %v2340_v35, %s2152_s8 }
 0x192   : > { %672 = vrot.lane.b32.xlu1 %v623_v36, %s2155_s11  ;;  %725 = vrot.lane.b32.xlu0 %v2340_v35, %s2153_s9 }
 0x196   : > { %676 = vrot.lane.b32.xlu1 %v623_v36, %s2156_s12  ;;  %729 = vrot.lane.b32.xlu0 %v2340_v35, %s2154_s10 }
 0x19a   : > { %680 = vrot.lane.b32.xlu1 %v623_v36, %s2157_s13  ;;  %733 = vrot.lane.b32.xlu0 %v2340_v35, %s2155_s11 }
 0x19e   : > { %684 = vrot.lane.b32.xlu1 %v623_v36, %s2158_s14  ;;  %737 = vrot.lane.b32.xlu0 %v2340_v35, %s2156_s12 }
 0x1a2   : > { %741 = vrot.lane.b32.xlu0 %v2340_v35, %s2157_s13  ;;  %745 = vrot.lane.b32.xlu1 %v2340_v35, %s2158_s14 }
 0x1dc   : > { %v690_v37 = vpop.permute.xlu1 %689  ;;  %v629_v38 = vpop.permute.xlu0 %628 }
 0x1dd   : > { %v631_v49 = vadd.f32 %v629_v38, %v623_v36  ;;  %v692_v56 = vadd.f32 %v690_v37, %v2340_v35 }
 0x1e0   : > { %v637_v39 = vpop.permute.xlu1 %636  ;;  %v633_v40 = vpop.permute.xlu0 %632 }
 0x1e1   : > { %v635_v50 = vadd.f32 %v633_v40, %v631_v49  ;;  %v2092_v49 = vld [vmem:[%s2763_s2 + $0x30] sm:$0xff]  }
 0x1e3   : > { %v639_v53 = vadd.f32 %v637_v39, %v635_v50  ;;  %v625_v39 = vld [vmem:[%s2764_s3] sm:$0x1]  ;;  %v2093_v50 = vld [vmem:[%s2763_s2 + $0xb0] sm:$0xff]  }
 0x1e4   : > { %v641_v41 = vpop.permute.xlu1 %640  ;;  %v694_v42 = vpop.permute.xlu0 %693 }
 0x1e5   : > { %v643_v57 = vadd.f32 %v641_v41, %v639_v53  ;;  %v696_v60 = vadd.f32 %v694_v42, %v692_v56  ;;  %v626_v42 = vld [vmem:[%s2764_s3 + $0x1] sm:$0x1]  ;;  %v2096_v53 = vld [vmem:[%s2763_s2 + $0xa8] sm:$0xff]  }
 0x1e6   : > { %v2099_v56 = vld [vmem:[%s2763_s2 + $0xa0] sm:$0xff]  }
 0x1e8   : > { %v645_v43 = vpop.permute.xlu1 %644  ;;  %v698_v44 = vpop.permute.xlu0 %697 }
 0x1e9   : > { %v647_v61 = vadd.f32 %v645_v43, %v643_v57  ;;  %v700_v62 = vadd.f32 %v698_v44, %v696_v60  ;;  %v2100_v57 = vld [vmem:[%s2763_s2 + $0x58] sm:$0xff]   ;;  %v2103_v60 = vld [vmem:[%s2763_s2 + $0x50] sm:$0xff]  }
 0x1ec   : > { %v649_v45 = vpop.permute.xlu1 %648  ;;  %v702_v46 = vpop.permute.xlu0 %701 }
 0x1ed   : > { %v651_v63 = vadd.f32 %v649_v45, %v647_v61  ;;  %v704_v3 = vadd.f32 %v702_v46, %v700_v62  ;;  %v2088_v45 = vld [vmem:[%s2763_s2 + $0x78] sm:$0xff]   ;;  %v2105_v61 = vld [vmem:[%s2763_s2 + $0x90] sm:$0xff]  }
 0x1ee   : > { %1932 = vmatprep.subr.bf16.mxu0 %v2088_v45  ;;  %v2089_v46 = vld [vmem:[%s2763_s2 + $0x38] sm:$0xff]   ;;  %v2104_v62 = vld [vmem:[%s2763_s2 + $0x10] sm:$0xff]  }
 0x1ef   : > { %1933 = vmatpush3.bf16.msra.mxu0 %v2089_v46  ;;  %v967_v46 = vlaneseq }
 0x1f0   : > { %v653_v47 = vpop.permute.xlu1 %652  ;;  %v706_v48 = vpop.permute.xlu0 %705 }
 0x1f1   : > { %v655_v4 = vadd.f32 %v653_v47, %v651_v63  ;;  %v708_v5 = vadd.f32 %v706_v48, %v704_v3  ;;  %v2090_v47 = vld [vmem:[%s2763_s2 + $0xb8] sm:$0xff]   ;;  %v2091_v48 = vld [vmem:[%s2763_s2 + $0x70] sm:$0xff]   ;;  %v2106_v63 = vld [vmem:[%s2763_s2 + $0x48] sm:$0xff]  }
 0x1f2   : > { %1970 = vmatprep.subr.bf16.mxu1 %v2090_v47  ;;  %1934 = vmatprep.subr.bf16.mxu0 %v2091_v48  ;;  %v2109_v3 = vld [vmem:[%s2763_s2 + $0x40] sm:$0xff]  }
 0x1f3   : > { %1971 = vmatpush3.bf16.msra.mxu1 %v2090_v47  ;;  %1935 = vmatpush3.bf16.msra.mxu0 %v2092_v49 }
 0x1f4   : > { %v657_v51 = vpop.permute.xlu1 %656  ;;  %v710_v52 = vpop.permute.xlu0 %709  ;;  %1972 = vmatprep.subr.bf16.mxu1 %v2093_v50 }
 0x1f5   : > { %v659_v6 = vadd.f32 %v657_v51, %v655_v4  ;;  %v712_v8 = vadd.f32 %v710_v52, %v708_v5  ;;  %v2094_v51 = vld [vmem:[%s2763_s2 + $0x68] sm:$0xff]   ;;  %v2110_v4 = vld [vmem:[%s2763_s2] sm:$0xff]  }
 0x1f6   : > { %v2095_v52 = vld [vmem:[%s2763_s2 + $0x28] sm:$0xff]   ;;  %1936 = vmatprep.subr.bf16.mxu0 %v2094_v51  ;;  %v2111_v5 = vld [vmem:[%s2763_s2 + $0x80] sm:$0xff]  }
 0x1f7   : > { %1973 = vmatpush3.bf16.msra.mxu1 %v2093_v50  ;;  %1937 = vmatpush3.bf16.msra.mxu0 %v2095_v52 }
 0x1f8   : > { %v661_v54 = vpop.permute.xlu1 %660  ;;  %v714_v55 = vpop.permute.xlu0 %713  ;;  %1974 = vmatprep.subr.bf16.mxu1 %v2096_v53 }
 0x1f9   : > { %v663_v9 = vadd.f32 %v661_v54, %v659_v6  ;;  %v716_v10 = vadd.f32 %v714_v55, %v712_v8  ;;  %v2097_v54 = vld [vmem:[%s2763_s2 + $0x60] sm:$0xff]  }
 0x1fa   : > { %v2098_v55 = vld [vmem:[%s2763_s2 + $0x20] sm:$0xff]   ;;  %1938 = vmatprep.subr.bf16.mxu0 %v2097_v54 }
 0x1fb   : > { %1975 = vmatpush3.bf16.msra.mxu1 %v2096_v53  ;;  %1939 = vmatpush3.bf16.msra.mxu0 %v2098_v55 }
 0x1fc   : > { %v665_v58 = vpop.permute.xlu1 %664  ;;  %v718_v59 = vpop.permute.xlu0 %717  ;;  %1976 = vmatprep.subr.bf16.mxu1 %v2099_v56  ;;  %1940 = vmatprep.subr.bf16.mxu0 %v2100_v57  ;;  %v968_v57 = vshrl.u32 %v967_v46, 7 }
 0x1fd   : > { %v667_v11 = vadd.f32 %v665_v58, %v663_v9  ;;  %v720_v14 = vadd.f32 %v718_v59, %v716_v10  ;;  %v2102_v58 = vld [vmem:[%s2763_s2 + $0x98] sm:$0xff]  }
 0x1fe   : > { %v2101_v59 = vld [vmem:[%s2763_s2 + $0x18] sm:$0xff]  }
 0x1ff   : > { %1977 = vmatpush3.bf16.msra.mxu1 %v2099_v56  ;;  %1941 = vmatpush3.bf16.msra.mxu0 %v2101_v59 }
 0x200   : > { %v669_v0 = vpop.permute.xlu1 %668  ;;  %v722_v1 = vpop.permute.xlu0 %721  ;;  %1978 = vmatprep.subr.bf16.mxu1 %v2102_v58  ;;  %1942 = vmatprep.subr.bf16.mxu0 %v2103_v60 }
 0x201   : > { %v671_v15 = vadd.f32 %v669_v0, %v667_v11  ;;  %v724_v16 = vadd.f32 %v722_v1, %v720_v14  ;;  %v2107_v0 = vld [vmem:[%s2763_s2 + $0x8] sm:$0xff]  }
 0x202   : > { %v2108_v1 = vld [vmem:[%s2763_s2 + $0x88] sm:$0xff]  }
 0x203   : > { %1979 = vmatpush3.bf16.msra.mxu1 %v2102_v58  ;;  %1943 = vmatpush3.bf16.msra.mxu0 %v2104_v62 }
 0x204   : > { %v673_v2 = vpop.permute.xlu1 %672  ;;  %v726_v7 = vpop.permute.xlu0 %725  ;;  %1980 = vmatprep.subr.bf16.mxu1 %v2105_v61  ;;  %1944 = vmatprep.subr.bf16.mxu0 %v2106_v63 }
 0x205   : > { %v675_v17 = vadd.f32 %v673_v2, %v671_v15  ;;  %v728_v20 = vadd.f32 %v726_v7, %v724_v16 }
 0x207   : > { %1981 = vmatpush3.bf16.msra.mxu1 %v2105_v61  ;;  %1945 = vmatpush3.bf16.msra.mxu0 %v2107_v0 }
 0x208   : > { %v677_v12 = vpop.permute.xlu1 %676  ;;  %v730_v13 = vpop.permute.xlu0 %729  ;;  %1982 = vmatprep.subr.bf16.mxu1 %v2108_v1  ;;  %1946 = vmatprep.subr.bf16.mxu0 %v2109_v3  ;;  %v971_v3 = vadd.s32 24, %v968_v57 }
 0x209   : > { %v679_v21 = vadd.f32 %v677_v12, %v675_v17  ;;  %v732_v22 = vadd.f32 %v730_v13, %v728_v20 }
 0x20b   : > { %1983 = vmatpush3.bf16.msra.mxu1 %v2108_v1  ;;  %1947 = vmatpush3.bf16.msra.mxu0 %v2110_v4  ;;  %v969_v1 = vadd.s32 8, %v968_v57 }
 0x20c   : > { %v681_v18 = vpop.permute.xlu1 %680  ;;  %v734_v19 = vpop.permute.xlu0 %733  ;;  %1984 = vmatprep.subr.bf16.mxu1 %v2111_v5 }
 0x20d   : > { %v683_v23 = vadd.f32 %v681_v18, %v679_v21  ;;  %v736_v26 = vadd.f32 %v734_v19, %v732_v22 }
 0x20f   : > { %1985 = vmatpush3.bf16.msra.mxu1 %v2111_v5  ;;  %v1903_v5 = vld [vmem:[#allocation2] sm:$0xff]  }
 0x210   : > { %v685_v24 = vpop.permute.xlu1 %684  ;;  %v738_v25 = vpop.permute.xlu0 %737 }
 0x211   : > { %v687_v27 = vadd.f32 %v685_v24, %v683_v23  ;;  %v740_v28 = vadd.f32 %v738_v25, %v736_v26 }
 0x213   : > { %v750_v31 = vmul.f32 0.001953125, %v687_v27 }
 0x214   : > { %v742_v29 = vpop.permute.xlu0 %741  ;;  %v746_v30 = vpop.permute.xlu1 %745 }
 0x215   : > { %v744_v32 = vadd.f32 %v742_v29, %v740_v28  ;;  %v752_v34 = vmul.f32 %v750_v31, %v750_v31 }
 0x217   : > { %v748_v33 = vadd.f32 %v746_v30, %v744_v32 }
 0x219   : > { %v751_v35 = vmul.f32 0.001953125, %v748_v33 }
 0x21b   : > { %v753_v36 = vsub.f32 %v751_v35, %v752_v34 }
 0x21d   : > { %v754_v37 = vmax.f32 %v753_v36, 0.0 }
 0x21f   : > { %v755_v38 = vadd.f32 1e-05, %v754_v37 }
 0x221   : > { %2112 = vrsqrt.f32 %v755_v38 }
 0x22e   : > { %v2113_v40 = vpop.eup %2112 }
 0x22f   : > { %v2391_v41 = vmul.f32 %v2113_v40, %v625_v39 }
 0x231   : > { %764 = vrot.lane.b32.xlu1 %v2391_v41, %s2157_s13  ;;  %761 = vrot.lane.b32.xlu0 %v2391_v41, %s2158_s14  ;;  %v758_v43 = vmul.f32 %v2391_v41, %v750_v31 }
 0x233   : > { %v2401_v44 = vsub.f32 %v626_v42, %v758_v43 }
 0x235   : > { %767 = vrot.lane.b32.xlu0 %v2391_v41, %s2156_s12  ;;  %837 = vrot.lane.b32.xlu1 %v2401_v44, %s2158_s14 }
 0x239   : > { %770 = vrot.lane.b32.xlu0 %v2391_v41, %s2155_s11  ;;  %840 = vrot.lane.b32.xlu1 %v2401_v44, %s2157_s13 }
 0x23d   : > { %773 = vrot.lane.b32.xlu0 %v2391_v41, %s2154_s10  ;;  %843 = vrot.lane.b32.xlu1 %v2401_v44, %s2156_s12 }
 0x241   : > { %776 = vrot.lane.b32.xlu0 %v2391_v41, %s2153_s9  ;;  %846 = vrot.lane.b32.xlu1 %v2401_v44, %s2155_s11 }
 0x245   : > { %779 = vrot.lane.b32.xlu0 %v2391_v41, %s2152_s8  ;;  %849 = vrot.lane.b32.xlu1 %v2401_v44, %s2154_s10 }
 0x249   : > { %782 = vrot.lane.b32.xlu0 %v2391_v41, %s2151_s7  ;;  %852 = vrot.lane.b32.xlu1 %v2401_v44, %s2153_s9 }
 0x24d   : > { %785 = vrot.lane.b32.xlu0 %v2391_v41, %s2150_s6  ;;  %855 = vrot.lane.b32.xlu1 %v2401_v44, %s2152_s8 }
 0x251   : > { %788 = vrot.lane.b32.xlu0 %v2391_v41, %s2149_s5  ;;  %858 = vrot.lane.b32.xlu1 %v2401_v44, %s2151_s7 }
 0x255   : > { %791 = vrot.lane.b32.xlu0 %v2391_v41, %s2148_s30  ;;  %861 = vrot.lane.b32.xlu1 %v2401_v44, %s2150_s6 }
 0x259   : > { %794 = vrot.lane.b32.xlu0 %v2391_v41, %s2147_s29  ;;  %864 = vrot.lane.b32.xlu1 %v2401_v44, %s2149_s5 }
 0x25d   : > { %797 = vrot.lane.b32.xlu0 %v2391_v41, %s2145_s27  ;;  %867 = vrot.lane.b32.xlu1 %v2401_v44, %s2148_s30 }
 0x261   : > { %800 = vrot.lane.b32.xlu0 %v2391_v41, %s2146_s28  ;;  %870 = vrot.lane.b32.xlu1 %v2401_v44, %s2147_s29 }
 0x265   : > { %803 = vrot.lane.b32.xlu0 %v2391_v41, %s2144_s26  ;;  %873 = vrot.lane.b32.xlu1 %v2401_v44, %s2145_s27 }
 0x269   : > { %876 = vrot.lane.b32.xlu0 %v2401_v44, %s2146_s28  ;;  %879 = vrot.lane.b32.xlu1 %v2401_v44, %s2144_s26 }
 0x2a3   : > { %v765_v6 = vpop.permute.xlu1 %764  ;;  %v762_v2 = vpop.permute.xlu0 %761 }
 0x2a4   : > { %v807_v25 = vsel %vm806_vm5, %v2391_v41, %v762_v2 }
 0x2a5   : > { %v809_v26 = vsel %vm808_vm6, %v807_v25, %v765_v6  ;;  %v976_v6 = vand.u32 15, %v968_v57 }
 0x2a7   : > { %v768_v7 = vpop.permute.xlu0 %767  ;;  %v838_v8 = vpop.permute.xlu1 %837  ;;  %vm2563_vm4 = vcmp.ne.s32.totalorder %v976_v6, 0 }
 0x2a8   : > { %v811_v29 = vsel %vm810_vm7, %v809_v26, %v768_v7  ;;  %v882_v32 = vsel %vm806_vm5, %v2401_v44, %v838_v8  ;;  %v1929_v7 = vld [vmem:[#allocation2 + $0x8] sm:$0xff]   ;;  %v1904_v8 = vunpack.c.l.bf16 %v1903_v5  ;;  %vm1032_vm5 = vmpackc.low %vm2563_vm4, %vm2563_vm4 }
 0x2ab   : > { %v771_v9 = vpop.permute.xlu0 %770  ;;  %v841_v10 = vpop.permute.xlu1 %840 }
 0x2ac   : > { %v813_v30 = vsel %vm812_vm8, %v811_v29, %v771_v9  ;;  %v883_v36 = vsel %vm808_vm6, %v882_v32, %v841_v10  ;;  %v983_v9 = vand.u32 15, %v969_v1  ;;  %v997_v10 = vand.u32 15, %v971_v3 }
 0x2ae   : > { %vm2570_vm6 = vcmp.ne.s32.totalorder %v983_v9, 15 }
 0x2af   : > { %v774_v11 = vpop.permute.xlu0 %773  ;;  %v844_v12 = vpop.permute.xlu1 %843 }
 0x2b0   : > { %v815_v31 = vsel %vm814_vm9, %v813_v30, %v774_v11  ;;  %v884_v38 = vsel %vm810_vm7, %v883_v36, %v844_v12  ;;  %v1905_v11 = vunpack.c.h.bf16 %v1903_v5  ;;  %vm2574_vm7 = vcmp.ne.s32.totalorder %v997_v10, 15 }
 0x2b3   : > { %v777_v13 = vpop.permute.xlu0 %776  ;;  %v847_v14 = vpop.permute.xlu1 %846 }
 0x2b4   : > { %v817_v33 = vsel %vm816_vm10, %v815_v31, %v777_v13  ;;  %v885_v40 = vsel %vm812_vm8, %v884_v38, %v847_v14  ;;  %v1908_v13 = vunpack.c.l.bf16 %v1929_v7  ;;  %v1909_v14 = vunpack.c.h.bf16 %v1929_v7 }
 0x2b5   : > { %vm2159_vm8 = vmmov 1  }
 0x2b7   : > { %v780_v15 = vpop.permute.xlu0 %779  ;;  %v850_v16 = vpop.permute.xlu1 %849 }
 0x2b8   : > { %v819_v37 = vsel %vm818_vm11, %v817_v33, %v780_v15  ;;  %v886_v42 = vsel %vm814_vm9, %v885_v40, %v850_v16  ;;  %vm1033_vm9 = vmpackc.low %vm2159_vm8, %vm2159_vm8 }
 0x2bb   : > { %v783_v17 = vpop.permute.xlu0 %782  ;;  %v853_v18 = vpop.permute.xlu1 %852 }
 0x2bc   : > { %v821_v39 = vsel %vm820_vm12, %v819_v37, %v783_v17  ;;  %v887_v47 = vsel %vm816_vm10, %v886_v42, %v853_v18  ;;  %v970_v18 = vadd.s32 16, %v968_v57  ;;  %vm1063_vm10 = vmpackc.low %vm2570_vm6, %vm2570_vm6 }
 0x2be   : > { %v990_v31 = vand.u32 15, %v970_v18 }
 0x2bf   : > { %v786_v19 = vpop.permute.xlu0 %785  ;;  %v856_v20 = vpop.permute.xlu1 %855 }
 0x2c0   : > { %v823_v41 = vsel %vm822_vm13, %v821_v39, %v786_v19  ;;  %v888_v49 = vsel %vm818_vm11, %v887_v47, %v856_v20  ;;  %vm1065_vm11 = vmpackc.low %vm2574_vm7, %vm2574_vm7 }
 0x2c3   : > { %v789_v21 = vpop.permute.xlu0 %788  ;;  %v859_v22 = vpop.permute.xlu1 %858 }
 0x2c4   : > { %v825_v43 = vsel %vm824_vm14, %v823_v41, %v789_v21  ;;  %v889_v51 = vsel %vm820_vm12, %v888_v49, %v859_v22  ;;  %vm935_vm12 = vsmask.f32 256 }
 0x2c7   : > { %v792_v23 = vpop.permute.xlu0 %791  ;;  %v862_v24 = vpop.permute.xlu1 %861 }
 0x2c8   : > { %v827_v48 = vsel %vm826_vm15, %v825_v43, %v792_v23  ;;  %v890_v53 = vsel %vm822_vm13, %v889_v51, %v862_v24  ;;  %vm953_vm13 = vcmask 1040384  }
 0x2cb   : > { %v795_v27 = vpop.permute.xlu0 %794  ;;  %v865_v28 = vpop.permute.xlu1 %864 }
 0x2cc   : > { %v829_v50 = vsel %vm828_vm0, %v827_v48, %v795_v27  ;;  %v891_v58 = vsel %vm824_vm14, %v890_v53, %v865_v28  ;;  %v2160_v28 = vmov 0   ;;  %vm956_vm14 = vsmask.f32 7424 }
 0x2cd   : > { %v1036_v29 = vsel %vm1032_vm5, 65537, %v2160_v28  ;;  %v1037_v30 = vsel %vm1033_vm9, 65537, %v2160_v28  ;;  %v1067_v36 = vsel %vm1063_vm10, 65537, %v2160_v28  ;;  %v1069_v39 = vsel %vm1065_vm11, 65537, %v2160_v28 }
 0x2ce   : > { %v1841_v40 = vcombine.low %v1036_v29, %v1037_v30  ;;  %v1844_v47 = vcombine.low %v1037_v30, %v1069_v39 }
 0x2cf   : > { %v798_v34 = vpop.permute.xlu0 %797  ;;  %v868_v35 = vpop.permute.xlu1 %867 }
 0x2d0   : > { %v831_v52 = vsel %vm830_vm2, %v829_v50, %v798_v34  ;;  %v892_v60 = vsel %vm826_vm15, %v891_v58, %v868_v35  ;;  %vm964_vm15 = vcmask 1047552   ;;  %vm1077_vm6 = vcmp.ne.s16.totalorder %v1844_v47, 0 }
 0x2d1   : > { %vm965_vm4 = vmand %vm964_vm15, %vm956_vm14 }
 0x2d3   : > { %v801_v44 = vpop.permute.xlu0 %800  ;;  %v871_v45 = vpop.permute.xlu1 %870 }
 0x2d4   : > { %v833_v54 = vsel %vm832_vm3, %v831_v52, %v801_v44  ;;  %v893_v61 = vsel %vm828_vm0, %v892_v60, %v871_v45  ;;  %vm2589_vm0 = vcmp.ne.s32.totalorder %v990_v31, 0  ;;  %v1843_v45 = vcombine.low %v1037_v30, %v1067_v36 }
 0x2d6   : > { %vm1076_vm5 = vcmp.ne.s16.totalorder %v1843_v45, 0 }
 0x2d7   : > { %v804_v55 = vpop.permute.xlu0 %803  ;;  %v874_v56 = vpop.permute.xlu1 %873 }
 0x2d8   : > { %v835_v59 = vsel %vm834_vm1, %v833_v54, %v804_v55  ;;  %v894_v62 = vsel %vm830_vm2, %v893_v61, %v874_v56  ;;  %vm2594_vm2 = vmand %vm953_vm13, %vm935_vm12 }
 0x2d9   : > { %897 = vst [vmem:[#allocation4] sm:$0x1] %v835_v59 }
 0x2db   : > { %v877_v63 = vpop.permute.xlu0 %876  ;;  %v880_v0 = vpop.permute.xlu1 %879 }
 0x2dc   : > { %v895_v4 = vsel %vm832_vm3, %v894_v62, %v877_v63  ;;  %vm1034_vm3 = vmpackc.low %vm2589_vm0, %vm2589_vm0 }
 0x2dd   : > { %v896_v2 = vsel %vm834_vm1, %v895_v4, %v880_v0  ;;  %vm1046_vm1 = vcmp.ne.s16.totalorder %v1841_v40, 0  ;;  %v1038_v55 = vsel %vm1034_vm3, 65537, %v2160_v28  ;;  %v1390_v40 = vld [vmem:[#allocation3 + $0x2] sm:$0x1] }
 0x2de   : > { %898 = vst [vmem:[#allocation4 + $0x1] sm:$0x1] %v896_v2  ;;  %v1842_v60 = vcombine.low %v1038_v55, %v1037_v30 }
 0x2e0   : > { %v1839_v15 = vld [vmem:[#allocation4] ss:$0 sm:$0xff]  ;;  %vm1047_vm7 = vcmp.ne.s16.totalorder %v1842_v60, 0 }
 0x2e1   : > { %v916_v19 = vmul.f32 %v1904_v8, %v1839_v15  ;;  %v917_v20 = vmul.f32 %v1905_v11, %v1839_v15  ;;  %v918_v21 = vmul.f32 %v1908_v13, %v1839_v15  ;;  %v919_v22 = vmul.f32 %v1909_v14, %v1839_v15 }
 0x2e5   : > { %v1840_v23 = vld [vmem:[#allocation4 + $0x1] ss:$0 sm:$0xff] }
 0x2e6   : > { %v925_v24 = vadd.f32 %v1840_v23, %v916_v19  ;;  %v926_v25 = vadd.f32 %v1840_v23, %v917_v20  ;;  %v927_v26 = vadd.f32 %v1840_v23, %v918_v21  ;;  %v928_v27 = vadd.f32 %v1840_v23, %v919_v22 }
 0x2e8   : > { %v929_v32 = vmax.f32 %v925_v24, 0.0  ;;  %v930_v33 = vmax.f32 %v926_v25, 0.0  ;;  %v931_v34 = vmax.f32 %v927_v26, 0.0  ;;  %v932_v35 = vmax.f32 %v928_v27, 0.0 }
 0x2ea   : > { %v933_v37 = vpack.c.bf16 %v930_v33, %v929_v32  ;;  %v934_v38 = vpack.c.bf16 %v932_v35, %v931_v34 }
 0x2ec   : > { %v937_v42 = vshrl.u32 %v933_v37, 16  ;;  %1304 = vmatprep.mubr.bf16.mxu0 %v933_v37  ;;  %v940_v43 = vshll.u32 %v933_v37, 16  ;;  %v947_v44 = vshll.u32 %v934_v38, 16  ;;  %v944_v51 = vshrl.u32 %v934_v38, 16 }
 0x2ee   : > { %v939_v48 = vrot.slane %v937_v42, 7  ;;  %v957_v49 = vrot.slane %v940_v43, 1  ;;  %v959_v50 = vrot.slane %v947_v44, 1  ;;  %v946_v58 = vrot.slane %v944_v51, 7 }
 0x2f0   : > { %v942_v52 = vor.u32 %v940_v43, %v939_v48  ;;  %v958_v53 = vor.u32 %v957_v49, %v937_v42  ;;  %v961_v54 = vor.u32 %v959_v50, %v944_v51  ;;  %v949_v61 = vor.u32 %v947_v44, %v946_v58  ;;  %v1402_v43 = vld [vmem:[#allocation3 + $0x3] sm:$0x1] }
 0x2f2   : > { %v955_v56 = vsel %vm2594_vm2, 0, %v942_v52  ;;  %v960_v57 = vsel %vm956_vm14, %v958_v53, %v959_v50  ;;  %v966_v59 = vsel %vm965_vm4, %v961_v54, 0  ;;  %v950_v62 = vsel %vm935_vm12, %v939_v48, %v949_v61 }
 0x2f3   : > { %1869 = vmatmul.mubr.msk.bf16.vlgmr.msra.gmra.mxu0 %vm1046_vm1, %v955_v56  ;;  %1986 = vmatprep.mubr.msk.bf16.mxu1 %vm1076_vm5, %v960_v57 }
 0x2f4   : > { %1312 = vmatprep.mubr.bf16.mxu0 %v934_v38  ;;  %1987 = vmatmul.mubr.msk.bf16.vlgmr.msra.gmra.mxu1 %vm1077_vm6, %v966_v59 }
 0x2fb   : > { %1870 = vmatmul.mubr.msk.bf16.gmra.mxu0 %vm1047_vm7, %v950_v62 }
 0x3b3   : > { %v1948_v63 = vpop.f32.mrf.mxu0 }
 0x3b4   : > { %v1988_v0 = vpop.f32.mrf.mxu1 }
 0x3b5   : > { %v1949_v1 = vpop.f32.mrf.mxu0 }
 0x3b6   : > { %v1355_v3 = vpop.f32.mrf.mxu1  ;;  %v1950_v5 = vadd.f32 %v1949_v1, %v1948_v63 }
 0x3b7   : > { %v1951_v4 = vpop.f32.mrf.mxu0 }
 0x3b8   : > { %v1989_v6 = vpop.f32.mrf.mxu1  ;;  %v1356_v10 = vadd.f32 %v1950_v5, %v1355_v3 }
 0x3b9   : > { %v1952_v2 = vpop.f32.mrf.mxu0 }
 0x3ba   : > { %v1953_v7 = vadd.f32 %v1952_v2, %v1951_v4  ;;  %v1358_v8 = vpop.f32.mrf.mxu1  ;;  %v1403_v19 = vmul.f32 %v1356_v10, %v1356_v10 }
 0x3bb   : > { %v1954_v9 = vpop.f32.mrf.mxu0 }
 0x3bc   : > { %v1359_v11 = vadd.f32 %v1953_v7, %v1358_v8 }
 0x3bd   : > { %v1955_v12 = vpop.f32.mrf.mxu0 }
 0x3be   : > { %v1913_v13 = vpack.c.bf16 %v1359_v11, %v1356_v10  ;;  %v1956_v14 = vadd.f32 %v1955_v12, %v1954_v9  ;;  %v1404_v16 = vmul.f32 %v1359_v11, %v1359_v11  ;;  %v1391_v20 = vadd.f32 %v1359_v11, %v1356_v10 }
 0x3bf   : > { %v1957_v15 = vpop.f32.mrf.mxu0 }
 0x3c0   : > { %1914 = vst [vmem:[#allocation2] sm:$0xff] %v1913_v13   ;;  %v1364_v17 = vadd.f32 %v1988_v0, %v1956_v14  ;;  %v1407_v23 = vadd.f32 %v1404_v16, %v1403_v19 }
 0x3c1   : > { %v1958_v18 = vpop.f32.mrf.mxu0 }
 0x3c2   : > { %v1405_v21 = vmul.f32 %v1364_v17, %v1364_v17  ;;  %v1959_v22 = vadd.f32 %v1958_v18, %v1957_v15  ;;  %v1392_v24 = vadd.f32 %v1391_v20, %v1364_v17 }
 0x3c4   : > { %v1367_v25 = vadd.f32 %v1989_v6, %v1959_v22  ;;  %v1408_v26 = vadd.f32 %v1407_v23, %v1405_v21 }
 0x3c6   : > { %v1918_v27 = vpack.c.bf16 %v1367_v25, %v1364_v17  ;;  %v1393_v28 = vadd.f32 %v1392_v24, %v1367_v25  ;;  %v1406_v29 = vmul.f32 %v1367_v25, %v1367_v25 }
 0x3c8   : > { %1930 = vst [vmem:[#allocation2 + $0x8] sm:$0xff] %v1918_v27   ;;  %v1394_v30 = vrot.slane %v1393_v28, 4  ;;  %v1409_v31 = vadd.f32 %v1408_v26, %v1406_v29 }
 0x3ca   : > { %v1395_v32 = vadd.f32 %v1394_v30, %v1393_v28  ;;  %v1410_v33 = vrot.slane %v1409_v31, 4 }
 0x3cc   : > { %v1396_v34 = vrot.slane %v1395_v32, 2  ;;  %v1411_v35 = vadd.f32 %v1410_v33, %v1409_v31 }
 0x3ce   : > { %v1397_v36 = vadd.f32 %v1396_v34, %v1395_v32  ;;  %v1412_v37 = vrot.slane %v1411_v35, 2 }
 0x3d0   : > { %v1398_v38 = vrot.slane %v1397_v36, 1  ;;  %v1413_v39 = vadd.f32 %v1412_v37, %v1411_v35 }
 0x3d2   : > { %v1399_v41 = vadd.f32 %v1398_v38, %v1397_v36  ;;  %v1414_v42 = vrot.slane %v1413_v39, 1 }
 0x3d4   : > { %v1400_v44 = vadd.f32 %v1399_v41, %v1390_v40  ;;  %v1415_v45 = vadd.f32 %v1414_v42, %v1413_v39 }
 0x3d6   : > { %1401 = vst [vmem:[#allocation3 + $0x2] sm:$0x1] %v1400_v44  ;;  %v1416_v46 = vadd.f32 %v1415_v45, %v1402_v43 }
 0x3d8   : > { %1417 = vst [vmem:[#allocation3 + $0x3] sm:$0x1] %v1416_v46 }
 0x3d9 PF: > { %p1877_p6 = scmp.ne.s32.totalorder %s2130_s15, 2 }
 0x3da   : > { %s2161_s26 = smov (!%p1877_p6), 120   ;;  %s2162_s30 = smov (!%p1877_p6), 104  }
 0x3db   : > { %1421 = sbr.rel (%p1877_p6) target bundleno = 1379 (0x563), region = 56  ;;  %s2163_s14 = smov (!%p1877_p6), 112  }
 0x3dc   : > { %s2164_s19 = smov (!%p1877_p6), 96   ;;  %s2165_s15 = smov (!%p1877_p6), 88  }
 0x3dd   : > { %s2166_s20 = smov (!%p1877_p6), 80   ;;  %s2167_s6 = smov (!%p1877_p6), 72  }
 0x3de   : > { %s2168_s21 = smov (!%p1877_p6), 64   ;;  %s2169_s22 = smov (!%p1877_p6), 56  }
 0x3df   : > { %s2170_s23 = smov (!%p1877_p6), 48   ;;  %s2171_s24 = smov (!%p1877_p6), 40  }
 0x3e0   : > { %v2608_v47 = vld [vmem:[#allocation3 + $0x3] sm:$0x1]  ;;  %v1426_v48 = vld [vmem:[#allocation3 + $0x2] sm:$0x1]  ;;  %s2172_s29 = smov 32   ;;  %s2173_s5 = smov 24  }
 0x3e1   : > { %1492 = vrot.lane.b32.xlu1 %v2608_v47, %s2161_s26  ;;  %1431 = vrot.lane.b32.xlu0 %v1426_v48, %s2161_s26  ;;  %s2174_s25 = smov 16   ;;  %s2175_s10 = smov 8   ;;  %vm1609_vm8 = vcmask 64512   ;;  %vm1611_vm9 = vcmask 130048   ;;  %vm1613_vm10 = vcmask 195584   ;;  %vm1615_vm11 = vcmask 261120  }
 0x3e2   : > { %vm1617_vm12 = vcmask 326656   ;;  %vm1619_vm13 = vcmask 392192   ;;  %vm1621_vm14 = vcmask 457728   ;;  %vm1623_vm15 = vcmask 523264  }
 0x3e3   : > { %vm1625_vm0 = vcmask 588800   ;;  %vm1627_vm2 = vcmask 654336   ;;  %vm1629_vm3 = vcmask 719872   ;;  %vm1631_vm1 = vcmask 785408  }
 0x3e4   : > { %vm1633_vm4 = vcmask 850944   ;;  %vm1635_vm5 = vcmask 916480   ;;  %vm1637_vm6 = vcmask 982016  }
 0x3e5   : > { %1439 = vrot.lane.b32.xlu1 %v1426_v48, %s2162_s30  ;;  %1435 = vrot.lane.b32.xlu0 %v1426_v48, %s2163_s14 }
 0x3e9   : > { %1443 = vrot.lane.b32.xlu1 %v1426_v48, %s2164_s19  ;;  %1496 = vrot.lane.b32.xlu0 %v2608_v47, %s2163_s14 }
 0x3ed   : > { %1447 = vrot.lane.b32.xlu1 %v1426_v48, %s2165_s15  ;;  %1500 = vrot.lane.b32.xlu0 %v2608_v47, %s2162_s30 }
 0x3f1   : > { %1451 = vrot.lane.b32.xlu1 %v1426_v48, %s2166_s20  ;;  %1504 = vrot.lane.b32.xlu0 %v2608_v47, %s2164_s19 }
 0x3f5   : > { %1455 = vrot.lane.b32.xlu1 %v1426_v48, %s2167_s6  ;;  %1508 = vrot.lane.b32.xlu0 %v2608_v47, %s2165_s15 }
 0x3f9   : > { %1459 = vrot.lane.b32.xlu1 %v1426_v48, %s2168_s21  ;;  %1512 = vrot.lane.b32.xlu0 %v2608_v47, %s2166_s20 }
 0x3fd   : > { %1463 = vrot.lane.b32.xlu1 %v1426_v48, %s2169_s22  ;;  %1516 = vrot.lane.b32.xlu0 %v2608_v47, %s2167_s6 }
 0x401   : > { %1467 = vrot.lane.b32.xlu1 %v1426_v48, %s2170_s23  ;;  %1520 = vrot.lane.b32.xlu0 %v2608_v47, %s2168_s21 }
 0x405   : > { %1471 = vrot.lane.b32.xlu1 %v1426_v48, %s2171_s24  ;;  %1524 = vrot.lane.b32.xlu0 %v2608_v47, %s2169_s22 }
 0x409   : > { %1475 = vrot.lane.b32.xlu1 %v1426_v48, %s2172_s29  ;;  %1528 = vrot.lane.b32.xlu0 %v2608_v47, %s2170_s23 }
 0x40d   : > { %1479 = vrot.lane.b32.xlu1 %v1426_v48, %s2173_s5  ;;  %1532 = vrot.lane.b32.xlu0 %v2608_v47, %s2171_s24 }
 0x411   : > { %1483 = vrot.lane.b32.xlu1 %v1426_v48, %s2174_s25  ;;  %1536 = vrot.lane.b32.xlu0 %v2608_v47, %s2172_s29 }
 0x415   : > { %1487 = vrot.lane.b32.xlu1 %v1426_v48, %s2175_s10  ;;  %1540 = vrot.lane.b32.xlu0 %v2608_v47, %s2173_s5 }
 0x419   : > { %1544 = vrot.lane.b32.xlu0 %v2608_v47, %s2174_s25  ;;  %1548 = vrot.lane.b32.xlu1 %v2608_v47, %s2175_s10 }
 0x453   : > { %v1493_v49 = vpop.permute.xlu1 %1492  ;;  %v1432_v50 = vpop.permute.xlu0 %1431 }
 0x454   : > { %v1434_v61 = vadd.f32 %v1432_v50, %v1426_v48  ;;  %v1495_v5 = vadd.f32 %v1493_v49, %v2608_v47 }
 0x457   : > { %v1440_v51 = vpop.permute.xlu1 %1439  ;;  %v1436_v52 = vpop.permute.xlu0 %1435 }
 0x458   : > { %v1438_v62 = vadd.f32 %v1436_v52, %v1434_v61 }
 0x45a   : > { %v1442_v1 = vadd.f32 %v1440_v51, %v1438_v62  ;;  %v1428_v51 = vld [vmem:[%s2764_s3 + $0x2] sm:$0x1] }
 0x45b   : > { %v1444_v53 = vpop.permute.xlu1 %1443  ;;  %v1497_v54 = vpop.permute.xlu0 %1496 }
 0x45c   : > { %v1446_v6 = vadd.f32 %v1444_v53, %v1442_v1  ;;  %v1499_v8 = vadd.f32 %v1497_v54, %v1495_v5  ;;  %v1429_v54 = vld [vmem:[%s2764_s3 + $0x3] sm:$0x1] }
 0x45f   : > { %v1448_v55 = vpop.permute.xlu1 %1447  ;;  %v1501_v56 = vpop.permute.xlu0 %1500 }
 0x460   : > { %v1450_v9 = vadd.f32 %v1448_v55, %v1446_v6  ;;  %v1503_v10 = vadd.f32 %v1501_v56, %v1499_v8 }
 0x463   : > { %v1452_v57 = vpop.permute.xlu1 %1451  ;;  %v1505_v58 = vpop.permute.xlu0 %1504 }
 0x464   : > { %v1454_v11 = vadd.f32 %v1452_v57, %v1450_v9  ;;  %v1507_v14 = vadd.f32 %v1505_v58, %v1503_v10 }
 0x467   : > { %v1456_v59 = vpop.permute.xlu1 %1455  ;;  %v1509_v60 = vpop.permute.xlu0 %1508 }
 0x468   : > { %v1458_v15 = vadd.f32 %v1456_v59, %v1454_v11  ;;  %v1511_v16 = vadd.f32 %v1509_v60, %v1507_v14 }
 0x46b   : > { %v1460_v63 = vpop.permute.xlu1 %1459  ;;  %v1513_v0 = vpop.permute.xlu0 %1512 }
 0x46c   : > { %v1462_v17 = vadd.f32 %v1460_v63, %v1458_v15  ;;  %v1515_v20 = vadd.f32 %v1513_v0, %v1511_v16 }
 0x46f   : > { %v1464_v3 = vpop.permute.xlu1 %1463  ;;  %v1517_v4 = vpop.permute.xlu0 %1516 }
 0x470   : > { %v1466_v21 = vadd.f32 %v1464_v3, %v1462_v17  ;;  %v1519_v22 = vadd.f32 %v1517_v4, %v1515_v20 }
 0x473   : > { %v1468_v2 = vpop.permute.xlu1 %1467  ;;  %v1521_v7 = vpop.permute.xlu0 %1520 }
 0x474   : > { %v1470_v23 = vadd.f32 %v1468_v2, %v1466_v21  ;;  %v1523_v26 = vadd.f32 %v1521_v7, %v1519_v22 }
 0x477   : > { %v1472_v12 = vpop.permute.xlu1 %1471  ;;  %v1525_v13 = vpop.permute.xlu0 %1524 }
 0x478   : > { %v1474_v27 = vadd.f32 %v1472_v12, %v1470_v23  ;;  %v1527_v28 = vadd.f32 %v1525_v13, %v1523_v26 }
 0x47b   : > { %v1476_v18 = vpop.permute.xlu1 %1475  ;;  %v1529_v19 = vpop.permute.xlu0 %1528 }
 0x47c   : > { %v1478_v29 = vadd.f32 %v1476_v18, %v1474_v27  ;;  %v1531_v32 = vadd.f32 %v1529_v19, %v1527_v28 }
 0x47f   : > { %v1480_v24 = vpop.permute.xlu1 %1479  ;;  %v1533_v25 = vpop.permute.xlu0 %1532 }
 0x480   : > { %v1482_v33 = vadd.f32 %v1480_v24, %v1478_v29  ;;  %v1535_v34 = vadd.f32 %v1533_v25, %v1531_v32 }
 0x483   : > { %v1484_v30 = vpop.permute.xlu1 %1483  ;;  %v1537_v31 = vpop.permute.xlu0 %1536 }
 0x484   : > { %v1486_v35 = vadd.f32 %v1484_v30, %v1482_v33  ;;  %v1539_v38 = vadd.f32 %v1537_v31, %v1535_v34 }
 0x487   : > { %v1488_v36 = vpop.permute.xlu1 %1487  ;;  %v1541_v37 = vpop.permute.xlu0 %1540 }
 0x488   : > { %v1490_v39 = vadd.f32 %v1488_v36, %v1486_v35  ;;  %v1543_v40 = vadd.f32 %v1541_v37, %v1539_v38 }
 0x48a   : > { %v1553_v43 = vmul.f32 0.001953125, %v1490_v39 }
 0x48b   : > { %v1545_v41 = vpop.permute.xlu0 %1544  ;;  %v1549_v42 = vpop.permute.xlu1 %1548 }
 0x48c   : > { %v1547_v44 = vadd.f32 %v1545_v41, %v1543_v40  ;;  %v1555_v46 = vmul.f32 %v1553_v43, %v1553_v43 }
 0x48e   : > { %v1551_v45 = vadd.f32 %v1549_v42, %v1547_v44 }
 0x490   : > { %v1554_v47 = vmul.f32 0.001953125, %v1551_v45 }
 0x492   : > { %v1556_v48 = vsub.f32 %v1554_v47, %v1555_v46 }
 0x494   : > { %v1557_v49 = vmax.f32 %v1556_v48, 0.0 }
 0x496   : > { %v1558_v50 = vadd.f32 1e-05, %v1557_v49 }
 0x498   : > { %2114 = vrsqrt.f32 %v1558_v50 }
 0x4a5   : > { %v2115_v52 = vpop.eup %2114 }
 0x4a6   : > { %v1560_v53 = vmul.f32 %v2115_v52, %v1428_v51  ;;  %v1921_v52 = vld [vmem:[#allocation2] sm:$0xff]  }
 0x4a8   : > { %1567 = vrot.lane.b32.xlu1 %v1560_v53, %s2174_s25  ;;  %1564 = vrot.lane.b32.xlu0 %v1560_v53, %s2175_s10  ;;  %v1561_v55 = vmul.f32 %v1560_v53, %v1553_v43 }
 0x4aa   : > { %v2664_v56 = vsub.f32 %v1429_v54, %v1561_v55  ;;  %v1922_v55 = vunpack.c.l.bf16 %v1921_v52 }
 0x4ac   : > { %1570 = vrot.lane.b32.xlu0 %v1560_v53, %s2173_s5  ;;  %1640 = vrot.lane.b32.xlu1 %v2664_v56, %s2175_s10 }
 0x4b0   : > { %1573 = vrot.lane.b32.xlu0 %v1560_v53, %s2172_s29  ;;  %1643 = vrot.lane.b32.xlu1 %v2664_v56, %s2174_s25 }
 0x4b4   : > { %1576 = vrot.lane.b32.xlu0 %v1560_v53, %s2171_s24  ;;  %1646 = vrot.lane.b32.xlu1 %v2664_v56, %s2173_s5 }
 0x4b8   : > { %1579 = vrot.lane.b32.xlu0 %v1560_v53, %s2170_s23  ;;  %1649 = vrot.lane.b32.xlu1 %v2664_v56, %s2172_s29 }
 0x4bc   : > { %1582 = vrot.lane.b32.xlu0 %v1560_v53, %s2169_s22  ;;  %1652 = vrot.lane.b32.xlu1 %v2664_v56, %s2171_s24 }
 0x4c0   : > { %1585 = vrot.lane.b32.xlu0 %v1560_v53, %s2168_s21  ;;  %1655 = vrot.lane.b32.xlu1 %v2664_v56, %s2170_s23 }
 0x4c4   : > { %1588 = vrot.lane.b32.xlu0 %v1560_v53, %s2167_s6  ;;  %1658 = vrot.lane.b32.xlu1 %v2664_v56, %s2169_s22 }
 0x4c8   : > { %1591 = vrot.lane.b32.xlu0 %v1560_v53, %s2166_s20  ;;  %1661 = vrot.lane.b32.xlu1 %v2664_v56, %s2168_s21 }
 0x4cc   : > { %1594 = vrot.lane.b32.xlu0 %v1560_v53, %s2165_s15  ;;  %1664 = vrot.lane.b32.xlu1 %v2664_v56, %s2167_s6 }
 0x4d0   : > { %1597 = vrot.lane.b32.xlu0 %v1560_v53, %s2164_s19  ;;  %1667 = vrot.lane.b32.xlu1 %v2664_v56, %s2166_s20 }
 0x4d4   : > { %1600 = vrot.lane.b32.xlu0 %v1560_v53, %s2162_s30  ;;  %1670 = vrot.lane.b32.xlu1 %v2664_v56, %s2165_s15 }
 0x4d8   : > { %1603 = vrot.lane.b32.xlu0 %v1560_v53, %s2163_s14  ;;  %1673 = vrot.lane.b32.xlu1 %v2664_v56, %s2164_s19 }
 0x4dc   : > { %1606 = vrot.lane.b32.xlu0 %v1560_v53, %s2161_s26  ;;  %1676 = vrot.lane.b32.xlu1 %v2664_v56, %s2162_s30 }
 0x4e0   : > { %1679 = vrot.lane.b32.xlu0 %v2664_v56, %s2163_s14  ;;  %1682 = vrot.lane.b32.xlu1 %v2664_v56, %s2161_s26 }
 0x51a   : > { %v1568_v57 = vpop.permute.xlu1 %1567  ;;  %v1565_v58 = vpop.permute.xlu0 %1564 }
 0x51b   : > { %v1610_v13 = vsel %vm1609_vm8, %v1560_v53, %v1565_v58  ;;  %v1931_v53 = vld [vmem:[#allocation2 + $0x8] sm:$0xff]  }
 0x51c   : > { %v1612_v14 = vsel %vm1611_vm9, %v1610_v13, %v1568_v57  ;;  %v1926_v57 = vunpack.c.l.bf16 %v1931_v53  ;;  %v1927_v58 = vunpack.c.h.bf16 %v1931_v53 }
 0x51e   : > { %v1571_v59 = vpop.permute.xlu0 %1570  ;;  %v1641_v60 = vpop.permute.xlu1 %1640 }
 0x51f   : > { %v1614_v17 = vsel %vm1613_vm10, %v1612_v14, %v1571_v59  ;;  %v1685_v20 = vsel %vm1609_vm8, %v2664_v56, %v1641_v60  ;;  %v1923_v56 = vunpack.c.h.bf16 %v1921_v52 }
 0x522   : > { %v1574_v61 = vpop.permute.xlu0 %1573  ;;  %v1644_v62 = vpop.permute.xlu1 %1643 }
 0x523   : > { %v1616_v18 = vsel %vm1615_vm11, %v1614_v17, %v1574_v61  ;;  %v1686_v24 = vsel %vm1611_vm9, %v1685_v20, %v1644_v62 }
 0x526   : > { %v1577_v63 = vpop.permute.xlu0 %1576  ;;  %v1647_v0 = vpop.permute.xlu1 %1646 }
 0x527   : > { %v1618_v19 = vsel %vm1617_vm12, %v1616_v18, %v1577_v63  ;;  %v1687_v26 = vsel %vm1613_vm10, %v1686_v24, %v1647_v0 }
 0x52a   : > { %v1580_v1 = vpop.permute.xlu0 %1579  ;;  %v1650_v3 = vpop.permute.xlu1 %1649 }
 0x52b   : > { %v1620_v21 = vsel %vm1619_vm13, %v1618_v19, %v1580_v1  ;;  %v1688_v28 = vsel %vm1615_vm11, %v1687_v26, %v1650_v3 }
 0x52e   : > { %v1583_v4 = vpop.permute.xlu0 %1582  ;;  %v1653_v5 = vpop.permute.xlu1 %1652 }
 0x52f   : > { %v1622_v25 = vsel %vm1621_vm14, %v1620_v21, %v1583_v4  ;;  %v1689_v30 = vsel %vm1617_vm12, %v1688_v28, %v1653_v5 }
 0x532   : > { %v1586_v6 = vpop.permute.xlu0 %1585  ;;  %v1656_v2 = vpop.permute.xlu1 %1655 }
 0x533   : > { %v1624_v27 = vsel %vm1623_vm15, %v1622_v25, %v1586_v6  ;;  %v1690_v34 = vsel %vm1619_vm13, %v1689_v30, %v1656_v2 }
 0x536   : > { %v1589_v7 = vpop.permute.xlu0 %1588  ;;  %v1659_v8 = vpop.permute.xlu1 %1658 }
 0x537   : > { %v1626_v29 = vsel %vm1625_vm0, %v1624_v27, %v1589_v7  ;;  %v1691_v36 = vsel %vm1621_vm14, %v1690_v34, %v1659_v8 }
 0x53a   : > { %v1592_v9 = vpop.permute.xlu0 %1591  ;;  %v1662_v10 = vpop.permute.xlu1 %1661 }
 0x53b   : > { %v1628_v31 = vsel %vm1627_vm2, %v1626_v29, %v1592_v9  ;;  %v1692_v38 = vsel %vm1623_vm15, %v1691_v36, %v1662_v10 }
 0x53e   : > { %v1595_v11 = vpop.permute.xlu0 %1594  ;;  %v1665_v12 = vpop.permute.xlu1 %1664 }
 0x53f   : > { %v1630_v35 = vsel %vm1629_vm3, %v1628_v31, %v1595_v11  ;;  %v1693_v40 = vsel %vm1625_vm0, %v1692_v38, %v1665_v12 }
 0x542   : > { %v1598_v15 = vpop.permute.xlu0 %1597  ;;  %v1668_v16 = vpop.permute.xlu1 %1667 }
 0x543   : > { %v1632_v37 = vsel %vm1631_vm1, %v1630_v35, %v1598_v15  ;;  %v1694_v44 = vsel %vm1627_vm2, %v1693_v40, %v1668_v16 }
 0x546   : > { %v1601_v22 = vpop.permute.xlu0 %1600  ;;  %v1671_v23 = vpop.permute.xlu1 %1670 }
 0x547   : > { %v1634_v39 = vsel %vm1633_vm4, %v1632_v37, %v1601_v22  ;;  %v1695_v46 = vsel %vm1629_vm3, %v1694_v44, %v1671_v23 }
 0x54a   : > { %v1604_v32 = vpop.permute.xlu0 %1603  ;;  %v1674_v33 = vpop.permute.xlu1 %1673 }
 0x54b   : > { %v1636_v41 = vsel %vm1635_vm5, %v1634_v39, %v1604_v32  ;;  %v1696_v47 = vsel %vm1631_vm1, %v1695_v46, %v1674_v33 }
 0x54e   : > { %v1607_v42 = vpop.permute.xlu0 %1606  ;;  %v1677_v43 = vpop.permute.xlu1 %1676 }
 0x54f   : > { %v1638_v45 = vsel %vm1637_vm6, %v1636_v41, %v1607_v42  ;;  %v1697_v48 = vsel %vm1633_vm4, %v1696_v47, %v1677_v43 }
 0x550   : > { %1700 = vst [vmem:[#allocation4 + $0x2] sm:$0x1] %v1638_v45 }
 0x552   : > { %v1680_v49 = vpop.permute.xlu0 %1679  ;;  %v1683_v50 = vpop.permute.xlu1 %1682 }
 0x553   : > { %v1698_v51 = vsel %vm1635_vm5, %v1697_v48, %v1680_v49 }
 0x554   : > { %v1699_v54 = vsel %vm1637_vm6, %v1698_v51, %v1683_v50 }
 0x555   : > { %1701 = vst [vmem:[#allocation4 + $0x3] sm:$0x1] %v1699_v54 }
 0x557   : > { %v1878_v59 = vld [vmem:[#allocation4 + $0x2] ss:$0 sm:$0xff] }
 0x558   : > { %v1719_v60 = vmul.f32 %v1922_v55, %v1878_v59  ;;  %v1720_v61 = vmul.f32 %v1923_v56, %v1878_v59  ;;  %v1721_v62 = vmul.f32 %v1926_v57, %v1878_v59  ;;  %v1722_v63 = vmul.f32 %v1927_v58, %v1878_v59 }
 0x55c   : > { %v1879_v0 = vld [vmem:[#allocation4 + $0x3] ss:$0 sm:$0xff] }
 0x55d   : > { %v1728_v1 = vadd.f32 %v1879_v0, %v1719_v60  ;;  %v1729_v3 = vadd.f32 %v1879_v0, %v1720_v61  ;;  %v1730_v4 = vadd.f32 %v1879_v0, %v1721_v62  ;;  %v1731_v5 = vadd.f32 %v1879_v0, %v1722_v63 }
 0x55f   : > { %v1732_v6 = vmax.f32 %v1728_v1, 0.0  ;;  %v1733_v2 = vmax.f32 %v1729_v3, 0.0  ;;  %v1734_v7 = vmax.f32 %v1730_v4, 0.0  ;;  %v1735_v8 = vmax.f32 %v1731_v5, 0.0 }
 0x561   : > { %1736 = vst [vmem:[%s2765_s4] sm:$0xff] %v1732_v6  ;;  %1737 = vst [vmem:[%s2765_s4 + $0x8] sm:$0xff] %v1733_v2 }
 0x562   : > { %1738 = vst [vmem:[%s2765_s4 + $0x10] sm:$0xff] %v1734_v7  ;;  %1739 = vst [vmem:[%s2765_s4 + $0x18] sm:$0xff] %v1735_v8 }
 0x563 PF: > { %s14_s17 = sadd.s32 1, %s2138_s17   ;;  %s2786_s15 = smov %s2134_s16 }
 0x564   : > { %p11_p7 = scmp.ge.s32.totalorder %s14_s17, 5   ;;  %s2787_s16 = smov %s2789_s18 }
 0x566   :  { %13 = sbr.rel (!%p11_p7) target bundleno = 2 (0x2), region = 93 }

</bundles_post_ra>
